<compile_context>
chip_gen: v6e
topology: v6e:2x2x1
jax: 0.10.0
libtpu: 0.0.40
codegen_flags: <defaults>
</compile_context>

<pallas_src>
import functools
import math

import jax
import jax.numpy as jnp
from jax.experimental import pallas as pl
from jax.experimental.pallas import tpu as pltpu


LN_EPS = 1e-5                      # PyTorch nn.LayerNorm default
_GELU_C = math.sqrt(2.0 / math.pi)


# ----------------------------------------------------------------------------
# Shared math helpers (used inside the kernel and by the JAX reference)
# ----------------------------------------------------------------------------

def _gelu(z):
    # TODO(synk): PyTorch nn.GELU() defaults to the exact erf form; the tanh
    # approximation is used (|diff| < ~1e-3) for a guaranteed EUP lowering.
    return 0.5 * z * (1.0 + jnp.tanh(_GELU_C * (z + 0.044715 * z * z * z)))


def _mm(a, b):
    return jnp.dot(a, b, preferred_element_type=jnp.float32)


def _ln_stats(z, inv_d):
    """LayerNorm stats via E[x^2] - mu^2: two independent lane reductions."""
    s1 = jnp.sum(z, axis=-1, keepdims=True)
    s2 = jnp.sum(z * z, axis=-1, keepdims=True)
    mu = s1 * inv_d
    var = s2 * inv_d - mu * mu
    return mu, jax.lax.rsqrt(var + LN_EPS)


def _layernorm_ref(z, gamma, beta):
    mu = jnp.mean(z, axis=-1, keepdims=True)
    var = jnp.mean(jnp.square(z - mu), axis=-1, keepdims=True)
    return (z - mu) * jax.lax.rsqrt(var + LN_EPS) * gamma + beta


# ----------------------------------------------------------------------------
# Fused Pallas kernel
# ----------------------------------------------------------------------------

def _informer_kernel(x_ref, u_ref, wt1_ref, slab_ref, out_ref, *, offs, dims):
    depth = dims["depth"]
    inv_d = dims["inv_d"]
    tok_rows = dims["tok_rows"]          # B * token_dim

    def S(name):                          # static, 8-aligned slab view -> load
        o, r = offs[name]
        return slab_ref[o:o + r, :]

    x = x_ref[...]                        # (B*Lin, enc_in)   batch-stacked input
    u = u_ref[...]                        # (B*Lout, B*Lin)   block-diag upsample

    # projection0 then upsample (associativity:  U (X W0) == (U X) W0)
    xw = _mm(x, S("W0"))                  # (B*Lin, d)
    h = _mm(u, xw) + S("b0")              # (n_stack, d)

    for blk in range(depth):
        p = lambda n, _b=blk: f"b{_b}_{n}"

        # ---- token mixing (transpose-free, batch block-diagonal) ----------
        mu, r = _ln_stats(h, inv_d)
        y = (h - mu) * r * S(p("g1")) + S(p("be1"))
        wt1 = wt1_ref[blk * tok_rows:(blk + 1) * tok_rows, :]   # (B*tok, n_stack)
        t = _gelu(_mm(wt1, y) + S(p("bt1")))                    # (B*tok, d)
        h = h + _mm(S(p("Wt2")), t) + S(p("bt2"))               # (n_stack, d)

        # ---- channel mixing (LN affine pre-folded into Wc1/bc1) -----------
        mu, r = _ln_stats(h, inv_d)
        yn = (h - mu) * r
        c = _gelu(_mm(yn, S(p("Wc1"))) + S(p("bc1")))           # (n_stack, d)
        h = h + _mm(c, S(p("Wc2"))) + S(p("bc2"))               # (n_stack, d)

    # ---- final LN (affine folded) + fused mlp_head∘projection -------------
    mu, r = _ln_stats(h, inv_d)
    yn = (h - mu) * r
    out = _mm(yn, S("Whp")) + S("bhp")                          # (n_stack, d) padded
    out_ref[...] = out.astype(out_ref.dtype)


def informer_forward(packed, x_enc):
    dims = packed["dims"]
    B, Lin, enc_in = x_enc.shape
    assert B == dims["batch"]
    n_stack = dims["n_stack"]
    d_model = dims["d_model"]
    c_out = dims["c_out"]

    x2 = x_enc.reshape(B * Lin, enc_in)   # batch-stacked input (free reshape)

    kernel = functools.partial(_informer_kernel, offs=packed["offs"], dims=dims)
    out_pad = pl.pallas_call(
        kernel,
        out_shape=jax.ShapeDtypeStruct((n_stack, d_model), jnp.float32),
        in_specs=[pl.BlockSpec(memory_space=pltpu.MemorySpace.VMEM)] * 4,
        out_specs=pl.BlockSpec(memory_space=pltpu.MemorySpace.VMEM),
    )(x2, packed["U_bd"], packed["wt1"], packed["slab"])

    # drop lane padding of the fused head and un-stack the batch
    return out_pad[:, :c_out].reshape(B, dims["num_patch"], c_out)


# ----------------------------------------------------------------------------
# Parameters: PyTorch-layout raw params + host-side fold/pack into slabs
# ----------------------------------------------------------------------------

def make_upsample_matrix(lin, scale=2):
    """(Lout, Lin) matrix implementing 1-D linear upsample, align_corners=True."""
    lout = lin * scale
    j = jnp.arange(lout, dtype=jnp.float32)
    s = j * (lin - 1) / (lout - 1)
    i0 = jnp.floor(s).astype(jnp.int32)
    i1 = jnp.minimum(i0 + 1, lin - 1)
    w = s - i0.astype(jnp.float32)
    eye = jnp.eye(lin, dtype=jnp.float32)
    return (1.0 - w)[:, None] * eye[i0] + w[:, None] * eye[i1]


def _block_diag(mats):
    rows = sum(m.shape[0] for m in mats)
    cols = sum(m.shape[1] for m in mats)
    out = jnp.zeros((rows, cols), jnp.float32)
    r = c = 0
    for m in mats:
        out = out.at[r:r + m.shape[0], c:c + m.shape[1]].set(m)
        r += m.shape[0]
        c += m.shape[1]
    return out


def init_params(key, enc_in, d_model, seq_len, c_out,
                depth=2, token_dim=64, channel_dim=64):
    num_patch = 2 * seq_len              # out_len == upsampled sequence length
    keys = iter(jax.random.split(key, 64))

    def lin(fan_in, shape):
        bound = 1.0 / math.sqrt(fan_in)
        return jax.random.uniform(next(keys), shape, jnp.float32, -bound, bound)

    def ln_gamma():
        return 1.0 + 0.05 * jax.random.normal(next(keys), (1, d_model), jnp.float32)

    def ln_beta():
        return 0.05 * jax.random.normal(next(keys), (1, d_model), jnp.float32)

    p = {}
    p["U"] = make_upsample_matrix(seq_len)
    p["W0"] = lin(enc_in, (enc_in, d_model))        # projection0 (in, out)
    p["b0"] = lin(enc_in, (1, d_model))

    p["blocks"] = []
    for _ in range(depth):
        blk = {}
        blk["g1"], blk["be1"] = ln_gamma(), ln_beta()
        # token-mix weights kept in PyTorch (out, in) layout; biases as columns
        blk["Wt1"] = lin(num_patch, (token_dim, num_patch))
        blk["bt1"] = lin(num_patch, (token_dim, 1))
        blk["Wt2"] = lin(token_dim, (num_patch, token_dim))
        blk["bt2"] = lin(token_dim, (num_patch, 1))
        blk["g2"], blk["be2"] = ln_gamma(), ln_beta()
        blk["Wc1"] = lin(d_model, (d_model, channel_dim))
        blk["bc1"] = lin(d_model, (1, channel_dim))
        blk["Wc2"] = lin(channel_dim, (channel_dim, d_model))
        blk["bc2"] = lin(channel_dim, (1, d_model))
        p["blocks"].append(blk)

    p["gF"], p["bF"] = ln_gamma(), ln_beta()
    p["Wh"] = lin(d_model, (d_model, d_model))      # mlp_head (dim -> d_model)
    p["bh"] = lin(d_model, (1, d_model))
    p["Wp"] = lin(d_model, (d_model, c_out))        # projection (d_model -> c_out)
    p["bp"] = lin(d_model, (1, c_out))
    return p


def pack_params(raw, batch):
    """Fold, block-diagonalize, pad and pack raw params into 3 kernel slabs."""
    d_model = raw["W0"].shape[1]
    c_out = raw["Wp"].shape[1]
    num_patch = raw["U"].shape[0]
    depth = len(raw["blocks"])
    token_dim = raw["blocks"][0]["Wt1"].shape[0]
    channel_dim = raw["blocks"][0]["Wc1"].shape[1]
    n_stack = batch * num_patch

    # block-diagonal linear-upsample over the batch-stacked time axis
    U_bd = _block_diag([raw["U"]] * batch)                     # (B*Lout, B*Lin)

    entries = []

    def add(name, arr):
        entries.append((name, jnp.asarray(arr, jnp.float32)))

    add("W0", raw["W0"])                                       # (enc_in, d)
    add("b0", raw["b0"])                                       # (1, d)

    wt1_parts = []
    for i, blk in enumerate(raw["blocks"]):
        add(f"b{i}_g1", blk["g1"])
        add(f"b{i}_be1", blk["be1"])

        # token mix: block-diag weights, biases pre-broadcast to full lane width
        wt1_parts.append(_block_diag([blk["Wt1"]] * batch))    # (B*tok, n_stack)
        bt1 = jnp.concatenate([blk["bt1"]] * batch, axis=0)    # (B*tok, 1)
        add(f"b{i}_bt1", jnp.broadcast_to(bt1, (batch * token_dim, d_model)))
        add(f"b{i}_Wt2", _block_diag([blk["Wt2"]] * batch))    # (n_stack, B*tok)
        bt2 = jnp.concatenate([blk["bt2"]] * batch, axis=0)    # (n_stack, 1)
        add(f"b{i}_bt2", jnp.broadcast_to(bt2, (n_stack, d_model)))

        # channel mix: fold LN affine (g2/be2) into Wc1/bc1; pad to 128 lanes
        Wc1f = blk["g2"].reshape(d_model, 1) * blk["Wc1"]      # (d, ch)
        bc1f = blk["be2"] @ blk["Wc1"] + blk["bc1"]            # (1, ch)
        add(f"b{i}_Wc1",
            jnp.zeros((d_model, d_model), jnp.float32).at[:, :channel_dim].set(Wc1f))
        add(f"b{i}_bc1",
            jnp.zeros((1, d_model), jnp.float32).at[:, :channel_dim].set(bc1f))
        add(f"b{i}_Wc2",
            jnp.zeros((d_model, d_model), jnp.float32).at[:channel_dim, :].set(blk["Wc2"]))
        add(f"b{i}_bc2", blk["bc2"])

    # fuse mlp_head and output projection, fold final-LN affine, pad to 128 lanes
    Whp = raw["Wh"] @ raw["Wp"]                                # (d, c_out)
    bhp = raw["bh"] @ raw["Wp"] + raw["bp"]                    # (1, c_out)
    Whpf = raw["gF"].reshape(d_model, 1) * Whp
    bhpf = raw["bF"] @ Whp + bhp
    add("Whp", jnp.zeros((d_model, d_model), jnp.float32).at[:, :c_out].set(Whpf))
    add("bhp", jnp.zeros((1, d_model), jnp.float32).at[:, :c_out].set(bhpf))

    # pack all 128-lane tensors into one row slab with 8-aligned static offsets
    offs, parts, row = {}, [], 0
    for name, arr in entries:
        offs[name] = (row, arr.shape[0])
        pad = (-arr.shape[0]) % 8
        if pad:
            arr = jnp.concatenate(
                [arr, jnp.zeros((pad, d_model), jnp.float32)], axis=0)
        parts.append(arr)
        row += arr.shape[0]
    slab = jnp.concatenate(parts, axis=0)                      # (R_total, 128)
    wt1_slab = jnp.concatenate(wt1_parts, axis=0)              # (depth*B*tok, n_stack)

    dims = dict(depth=depth, inv_d=1.0 / d_model, tok_rows=batch * token_dim,
                n_stack=n_stack, num_patch=num_patch, c_out=c_out,
                d_model=d_model, batch=batch)
    return dict(U_bd=U_bd, wt1=wt1_slab, slab=slab, offs=offs, dims=dims)


# ----------------------------------------------------------------------------
# Pure-JAX reference (standard, unfolded formulation; PyTorch semantics)
# ----------------------------------------------------------------------------

def informer_reference(raw, x_enc):
    U = raw["U"]
    x = jnp.einsum("oi,bic->boc", U, x_enc)                 # upsample along time
    h = x @ raw["W0"] + raw["b0"]                           # projection0

    for blk in raw["blocks"]:
        y = _layernorm_ref(h, blk["g1"], blk["be1"])
        t = _gelu(jnp.einsum("tn,bnd->btd", blk["Wt1"], y) + blk["bt1"][None])
        t = jnp.einsum("nt,btd->bnd", blk["Wt2"], t) + blk["bt2"][None]
        h = h + t
        y = _layernorm_ref(h, blk["g2"], blk["be2"])
        c = _gelu(y @ blk["Wc1"] + blk["bc1"])
        c = c @ blk["Wc2"] + blk["bc2"]
        h = h + c

    y = _layernorm_ref(h, raw["gF"], raw["bF"])
    y = y @ raw["Wh"] + raw["bh"]
    return y @ raw["Wp"] + raw["bp"]


# ----------------------------------------------------------------------------
# Main
# ----------------------------------------------------------------------------

if __name__ == "__main__":
    B, enc_in, seq_len = 2, 8, 8
    d_model, c_out = 128, 8
    depth, token_dim, channel_dim = 2, 64, 64
    out_len = 2 * seq_len        # InformerL requires num_patch == upsampled length

    key = jax.random.PRNGKey(0)
    k_param, k_x = jax.random.split(key)

    raw = init_params(k_param, enc_in, d_model, seq_len, c_out,
                      depth, token_dim, channel_dim)
    x_enc = jax.random.normal(k_x, (B, seq_len, enc_in), jnp.float32)

    packed = pack_params(raw, B)
    out = informer_forward(packed, x_enc)
    jax.block_until_ready(out)

    ref = informer_reference(raw, x_enc)
    assert out.shape == (B, out_len, c_out), f"bad output shape {out.shape}"
    assert jnp.allclose(out, ref, atol=1e-3, rtol=1e-3), "output mismatch vs reference"

    print("KERNEL_OK")
</pallas_src>

<mosaic_0001>
module attributes {stable_mosaic.version = 11 : i64} {
  func.func @_informer_kernel(%arg0: memref<16x8xf32, #tpu.memory_space<vmem>>, %arg1: memref<32x16xf32, #tpu.memory_space<vmem>>, %arg2: memref<256x32xf32, #tpu.memory_space<vmem>>, %arg3: memref<1112x128xf32, #tpu.memory_space<vmem>>, %arg4: memref<32x128xf32, #tpu.memory_space<vmem>>) attributes {dimension_semantics = [], scalar_prefetch = 0 : i64, scratch_operands = 0 : i64, tpu.core_type = #tpu.core_type<tc>} {
    %c0 = arith.constant 0 : index
    %c0_0 = arith.constant 0 : index
    %0 = vector.load %arg0[%c0, %c0_0] : memref<16x8xf32, #tpu.memory_space<vmem>>, vector<16x8xf32>
    %c0_1 = arith.constant 0 : index
    %c0_2 = arith.constant 0 : index
    %1 = vector.load %arg1[%c0_1, %c0_2] : memref<32x16xf32, #tpu.memory_space<vmem>>, vector<32x16xf32>
    %c0_3 = arith.constant 0 : index
    %c0_4 = arith.constant 0 : index
    %2 = vector.load %arg3[%c0_3, %c0_4] : memref<1112x128xf32, #tpu.memory_space<vmem>>, vector<8x128xf32>
    %cst = arith.constant dense<0.000000e+00> : vector<16x128xf32>
    %3 = tpu.matmul %0, %2, %cst {dimension_numbers = #tpu.dot_dimension_numbers<[1], [0], [0], [1], [0, 0, 1, 1], [], []>} : vector<16x8xf32>, vector<8x128xf32>, vector<16x128xf32> -> vector<16x128xf32>
    %cst_5 = arith.constant dense<0.000000e+00> : vector<32x128xf32>
    %4 = tpu.matmul %1, %3, %cst_5 {dimension_numbers = #tpu.dot_dimension_numbers<[1], [0], [0], [1], [0, 0, 1, 1], [], []>} : vector<32x16xf32>, vector<16x128xf32>, vector<32x128xf32> -> vector<32x128xf32>
    %c8 = arith.constant 8 : index
    %c0_6 = arith.constant 0 : index
    %5 = vector.load %arg3[%c8, %c0_6] : memref<1112x128xf32, #tpu.memory_space<vmem>>, vector<1x128xf32>
    %6 = vector.broadcast %5 : vector<1x128xf32> to vector<32x128xf32>
    %7 = arith.addf %4, %6 : vector<32x128xf32>
    %cst_7 = arith.constant dense<0.000000e+00> : vector<32xf32>
    %8 = vector.multi_reduction <add>, %7, %cst_7 [1] : vector<32x128xf32> to vector<32xf32>
    %9 = vector.shape_cast %8 : vector<32xf32> to vector<32x1xf32>
    %10 = arith.mulf %7, %7 : vector<32x128xf32>
    %cst_8 = arith.constant dense<0.000000e+00> : vector<32xf32>
    %11 = vector.multi_reduction <add>, %10, %cst_8 [1] : vector<32x128xf32> to vector<32xf32>
    %12 = vector.shape_cast %11 : vector<32xf32> to vector<32x1xf32>
    %cst_9 = arith.constant 7.812500e-03 : f32
    %13 = vector.broadcast %cst_9 : f32 to vector<32x1xf32>
    %14 = arith.mulf %9, %13 : vector<32x1xf32>
    %cst_10 = arith.constant 7.812500e-03 : f32
    %15 = vector.broadcast %cst_10 : f32 to vector<32x1xf32>
    %16 = arith.mulf %12, %15 : vector<32x1xf32>
    %17 = arith.mulf %14, %14 : vector<32x1xf32>
    %18 = arith.subf %16, %17 : vector<32x1xf32>
    %cst_11 = arith.constant 9.99999974E-6 : f32
    %19 = vector.broadcast %cst_11 : f32 to vector<32x1xf32>
    %20 = arith.addf %18, %19 : vector<32x1xf32>
    %21 = math.rsqrt %20 : vector<32x1xf32>
    %22 = vector.broadcast %14 : vector<32x1xf32> to vector<32x128xf32>
    %23 = arith.subf %7, %22 : vector<32x128xf32>
    %24 = vector.broadcast %21 : vector<32x1xf32> to vector<32x128xf32>
    %25 = arith.mulf %23, %24 : vector<32x128xf32>
    %c16 = arith.constant 16 : index
    %c0_12 = arith.constant 0 : index
    %26 = vector.load %arg3[%c16, %c0_12] : memref<1112x128xf32, #tpu.memory_space<vmem>>, vector<1x128xf32>
    %27 = vector.broadcast %26 : vector<1x128xf32> to vector<32x128xf32>
    %28 = arith.mulf %25, %27 : vector<32x128xf32>
    %c24 = arith.constant 24 : index
    %c0_13 = arith.constant 0 : index
    %29 = vector.load %arg3[%c24, %c0_13] : memref<1112x128xf32, #tpu.memory_space<vmem>>, vector<1x128xf32>
    %30 = vector.broadcast %29 : vector<1x128xf32> to vector<32x128xf32>
    %31 = arith.addf %28, %30 : vector<32x128xf32>
    %c0_14 = arith.constant 0 : index
    %c0_15 = arith.constant 0 : index
    %32 = vector.load %arg2[%c0_14, %c0_15] : memref<256x32xf32, #tpu.memory_space<vmem>>, vector<128x32xf32>
    %cst_16 = arith.constant dense<0.000000e+00> : vector<128x128xf32>
    %33 = tpu.matmul %32, %31, %cst_16 {dimension_numbers = #tpu.dot_dimension_numbers<[1], [0], [0], [1], [0, 0, 1, 1], [], []>} : vector<128x32xf32>, vector<32x128xf32>, vector<128x128xf32> -> vector<128x128xf32>
    %c32 = arith.constant 32 : index
    %c0_17 = arith.constant 0 : index
    %34 = vector.load %arg3[%c32, %c0_17] : memref<1112x128xf32, #tpu.memory_space<vmem>>, vector<128x128xf32>
    %35 = arith.addf %33, %34 : vector<128x128xf32>
    %cst_18 = arith.constant 5.000000e-01 : f32
    %36 = vector.broadcast %cst_18 : f32 to vector<128x128xf32>
    %37 = arith.mulf %36, %35 : vector<128x128xf32>
    %cst_19 = arith.constant 4.471500e-02 : f32
    %38 = vector.broadcast %cst_19 : f32 to vector<128x128xf32>
    %39 = arith.mulf %38, %35 : vector<128x128xf32>
    %40 = arith.mulf %39, %35 : vector<128x128xf32>
    %41 = arith.mulf %40, %35 : vector<128x128xf32>
    %42 = arith.addf %35, %41 : vector<128x128xf32>
    %cst_20 = arith.constant 0.797884583 : f32
    %43 = vector.broadcast %cst_20 : f32 to vector<128x128xf32>
    %44 = arith.mulf %43, %42 : vector<128x128xf32>
    %45 = math.tanh %44 : vector<128x128xf32>
    %cst_21 = arith.constant 1.000000e+00 : f32
    %46 = vector.broadcast %cst_21 : f32 to vector<128x128xf32>
    %47 = arith.addf %46, %45 : vector<128x128xf32>
    %48 = arith.mulf %37, %47 : vector<128x128xf32>
    %c160 = arith.constant 160 : index
    %c0_22 = arith.constant 0 : index
    %49 = vector.load %arg3[%c160, %c0_22] : memref<1112x128xf32, #tpu.memory_space<vmem>>, vector<32x128xf32>
    %cst_23 = arith.constant dense<0.000000e+00> : vector<32x128xf32>
    %50 = tpu.matmul %49, %48, %cst_23 {dimension_numbers = #tpu.dot_dimension_numbers<[1], [0], [0], [1], [0, 0, 1, 1], [], []>} : vector<32x128xf32>, vector<128x128xf32>, vector<32x128xf32> -> vector<32x128xf32>
    %51 = arith.addf %7, %50 : vector<32x128xf32>
    %c192 = arith.constant 192 : index
    %c0_24 = arith.constant 0 : index
    %52 = vector.load %arg3[%c192, %c0_24] : memref<1112x128xf32, #tpu.memory_space<vmem>>, vector<32x128xf32>
    %53 = arith.addf %51, %52 : vector<32x128xf32>
    %cst_25 = arith.constant dense<0.000000e+00> : vector<32xf32>
    %54 = vector.multi_reduction <add>, %53, %cst_25 [1] : vector<32x128xf32> to vector<32xf32>
    %55 = vector.shape_cast %54 : vector<32xf32> to vector<32x1xf32>
    %56 = arith.mulf %53, %53 : vector<32x128xf32>
    %cst_26 = arith.constant dense<0.000000e+00> : vector<32xf32>
    %57 = vector.multi_reduction <add>, %56, %cst_26 [1] : vector<32x128xf32> to vector<32xf32>
    %58 = vector.shape_cast %57 : vector<32xf32> to vector<32x1xf32>
    %cst_27 = arith.constant 7.812500e-03 : f32
    %59 = vector.broadcast %cst_27 : f32 to vector<32x1xf32>
    %60 = arith.mulf %55, %59 : vector<32x1xf32>
    %cst_28 = arith.constant 7.812500e-03 : f32
    %61 = vector.broadcast %cst_28 : f32 to vector<32x1xf32>
    %62 = arith.mulf %58, %61 : vector<32x1xf32>
    %63 = arith.mulf %60, %60 : vector<32x1xf32>
    %64 = arith.subf %62, %63 : vector<32x1xf32>
    %cst_29 = arith.constant 9.99999974E-6 : f32
    %65 = vector.broadcast %cst_29 : f32 to vector<32x1xf32>
    %66 = arith.addf %64, %65 : vector<32x1xf32>
    %67 = math.rsqrt %66 : vector<32x1xf32>
    %68 = vector.broadcast %60 : vector<32x1xf32> to vector<32x128xf32>
    %69 = arith.subf %53, %68 : vector<32x128xf32>
    %70 = vector.broadcast %67 : vector<32x1xf32> to vector<32x128xf32>
    %71 = arith.mulf %69, %70 : vector<32x128xf32>
    %c224 = arith.constant 224 : index
    %c0_30 = arith.constant 0 : index
    %72 = vector.load %arg3[%c224, %c0_30] : memref<1112x128xf32, #tpu.memory_space<vmem>>, vector<128x128xf32>
    %cst_31 = arith.constant dense<0.000000e+00> : vector<32x128xf32>
    %73 = tpu.matmul %71, %72, %cst_31 {dimension_numbers = #tpu.dot_dimension_numbers<[1], [0], [0], [1], [0, 0, 1, 1], [], []>} : vector<32x128xf32>, vector<128x128xf32>, vector<32x128xf32> -> vector<32x128xf32>
    %c352 = arith.constant 352 : index
    %c0_32 = arith.constant 0 : index
    %74 = vector.load %arg3[%c352, %c0_32] : memref<1112x128xf32, #tpu.memory_space<vmem>>, vector<1x128xf32>
    %75 = vector.broadcast %74 : vector<1x128xf32> to vector<32x128xf32>
    %76 = arith.addf %73, %75 : vector<32x128xf32>
    %cst_33 = arith.constant 5.000000e-01 : f32
    %77 = vector.broadcast %cst_33 : f32 to vector<32x128xf32>
    %78 = arith.mulf %77, %76 : vector<32x128xf32>
    %cst_34 = arith.constant 4.471500e-02 : f32
    %79 = vector.broadcast %cst_34 : f32 to vector<32x128xf32>
    %80 = arith.mulf %79, %76 : vector<32x128xf32>
    %81 = arith.mulf %80, %76 : vector<32x128xf32>
    %82 = arith.mulf %81, %76 : vector<32x128xf32>
    %83 = arith.addf %76, %82 : vector<32x128xf32>
    %cst_35 = arith.constant 0.797884583 : f32
    %84 = vector.broadcast %cst_35 : f32 to vector<32x128xf32>
    %85 = arith.mulf %84, %83 : vector<32x128xf32>
    %86 = math.tanh %85 : vector<32x128xf32>
    %cst_36 = arith.constant 1.000000e+00 : f32
    %87 = vector.broadcast %cst_36 : f32 to vector<32x128xf32>
    %88 = arith.addf %87, %86 : vector<32x128xf32>
    %89 = arith.mulf %78, %88 : vector<32x128xf32>
    %c360 = arith.constant 360 : index
    %c0_37 = arith.constant 0 : index
    %90 = vector.load %arg3[%c360, %c0_37] : memref<1112x128xf32, #tpu.memory_space<vmem>>, vector<128x128xf32>
    %cst_38 = arith.constant dense<0.000000e+00> : vector<32x128xf32>
    %91 = tpu.matmul %89, %90, %cst_38 {dimension_numbers = #tpu.dot_dimension_numbers<[1], [0], [0], [1], [0, 0, 1, 1], [], []>} : vector<32x128xf32>, vector<128x128xf32>, vector<32x128xf32> -> vector<32x128xf32>
    %92 = arith.addf %53, %91 : vector<32x128xf32>
    %c488 = arith.constant 488 : index
    %c0_39 = arith.constant 0 : index
    %93 = vector.load %arg3[%c488, %c0_39] : memref<1112x128xf32, #tpu.memory_space<vmem>>, vector<1x128xf32>
    %94 = vector.broadcast %93 : vector<1x128xf32> to vector<32x128xf32>
    %95 = arith.addf %92, %94 : vector<32x128xf32>
    %cst_40 = arith.constant dense<0.000000e+00> : vector<32xf32>
    %96 = vector.multi_reduction <add>, %95, %cst_40 [1] : vector<32x128xf32> to vector<32xf32>
    %97 = vector.shape_cast %96 : vector<32xf32> to vector<32x1xf32>
    %98 = arith.mulf %95, %95 : vector<32x128xf32>
    %cst_41 = arith.constant dense<0.000000e+00> : vector<32xf32>
    %99 = vector.multi_reduction <add>, %98, %cst_41 [1] : vector<32x128xf32> to vector<32xf32>
    %100 = vector.shape_cast %99 : vector<32xf32> to vector<32x1xf32>
    %cst_42 = arith.constant 7.812500e-03 : f32
    %101 = vector.broadcast %cst_42 : f32 to vector<32x1xf32>
    %102 = arith.mulf %97, %101 : vector<32x1xf32>
    %cst_43 = arith.constant 7.812500e-03 : f32
    %103 = vector.broadcast %cst_43 : f32 to vector<32x1xf32>
    %104 = arith.mulf %100, %103 : vector<32x1xf32>
    %105 = arith.mulf %102, %102 : vector<32x1xf32>
    %106 = arith.subf %104, %105 : vector<32x1xf32>
    %cst_44 = arith.constant 9.99999974E-6 : f32
    %107 = vector.broadcast %cst_44 : f32 to vector<32x1xf32>
    %108 = arith.addf %106, %107 : vector<32x1xf32>
    %109 = math.rsqrt %108 : vector<32x1xf32>
    %110 = vector.broadcast %102 : vector<32x1xf32> to vector<32x128xf32>
    %111 = arith.subf %95, %110 : vector<32x128xf32>
    %112 = vector.broadcast %109 : vector<32x1xf32> to vector<32x128xf32>
    %113 = arith.mulf %111, %112 : vector<32x128xf32>
    %c496 = arith.constant 496 : index
    %c0_45 = arith.constant 0 : index
    %114 = vector.load %arg3[%c496, %c0_45] : memref<1112x128xf32, #tpu.memory_space<vmem>>, vector<1x128xf32>
    %115 = vector.broadcast %114 : vector<1x128xf32> to vector<32x128xf32>
    %116 = arith.mulf %113, %115 : vector<32x128xf32>
    %c504 = arith.constant 504 : index
    %c0_46 = arith.constant 0 : index
    %117 = vector.load %arg3[%c504, %c0_46] : memref<1112x128xf32, #tpu.memory_space<vmem>>, vector<1x128xf32>
    %118 = vector.broadcast %117 : vector<1x128xf32> to vector<32x128xf32>
    %119 = arith.addf %116, %118 : vector<32x128xf32>
    %c128 = arith.constant 128 : index
    %c0_47 = arith.constant 0 : index
    %120 = vector.load %arg2[%c128, %c0_47] : memref<256x32xf32, #tpu.memory_space<vmem>>, vector<128x32xf32>
    %cst_48 = arith.constant dense<0.000000e+00> : vector<128x128xf32>
    %121 = tpu.matmul %120, %119, %cst_48 {dimension_numbers = #tpu.dot_dimension_numbers<[1], [0], [0], [1], [0, 0, 1, 1], [], []>} : vector<128x32xf32>, vector<32x128xf32>, vector<128x128xf32> -> vector<128x128xf32>
    %c512 = arith.constant 512 : index
    %c0_49 = arith.constant 0 : index
    %122 = vector.load %arg3[%c512, %c0_49] : memref<1112x128xf32, #tpu.memory_space<vmem>>, vector<128x128xf32>
    %123 = arith.addf %121, %122 : vector<128x128xf32>
    %cst_50 = arith.constant 5.000000e-01 : f32
    %124 = vector.broadcast %cst_50 : f32 to vector<128x128xf32>
    %125 = arith.mulf %124, %123 : vector<128x128xf32>
    %cst_51 = arith.constant 4.471500e-02 : f32
    %126 = vector.broadcast %cst_51 : f32 to vector<128x128xf32>
    %127 = arith.mulf %126, %123 : vector<128x128xf32>
    %128 = arith.mulf %127, %123 : vector<128x128xf32>
    %129 = arith.mulf %128, %123 : vector<128x128xf32>
    %130 = arith.addf %123, %129 : vector<128x128xf32>
    %cst_52 = arith.constant 0.797884583 : f32
    %131 = vector.broadcast %cst_52 : f32 to vector<128x128xf32>
    %132 = arith.mulf %131, %130 : vector<128x128xf32>
    %133 = math.tanh %132 : vector<128x128xf32>
    %cst_53 = arith.constant 1.000000e+00 : f32
    %134 = vector.broadcast %cst_53 : f32 to vector<128x128xf32>
    %135 = arith.addf %134, %133 : vector<128x128xf32>
    %136 = arith.mulf %125, %135 : vector<128x128xf32>
    %c640 = arith.constant 640 : index
    %c0_54 = arith.constant 0 : index
    %137 = vector.load %arg3[%c640, %c0_54] : memref<1112x128xf32, #tpu.memory_space<vmem>>, vector<32x128xf32>
    %cst_55 = arith.constant dense<0.000000e+00> : vector<32x128xf32>
    %138 = tpu.matmul %137, %136, %cst_55 {dimension_numbers = #tpu.dot_dimension_numbers<[1], [0], [0], [1], [0, 0, 1, 1], [], []>} : vector<32x128xf32>, vector<128x128xf32>, vector<32x128xf32> -> vector<32x128xf32>
    %139 = arith.addf %95, %138 : vector<32x128xf32>
    %c672 = arith.constant 672 : index
    %c0_56 = arith.constant 0 : index
    %140 = vector.load %arg3[%c672, %c0_56] : memref<1112x128xf32, #tpu.memory_space<vmem>>, vector<32x128xf32>
    %141 = arith.addf %139, %140 : vector<32x128xf32>
    %cst_57 = arith.constant dense<0.000000e+00> : vector<32xf32>
    %142 = vector.multi_reduction <add>, %141, %cst_57 [1] : vector<32x128xf32> to vector<32xf32>
    %143 = vector.shape_cast %142 : vector<32xf32> to vector<32x1xf32>
    %144 = arith.mulf %141, %141 : vector<32x128xf32>
    %cst_58 = arith.constant dense<0.000000e+00> : vector<32xf32>
    %145 = vector.multi_reduction <add>, %144, %cst_58 [1] : vector<32x128xf32> to vector<32xf32>
    %146 = vector.shape_cast %145 : vector<32xf32> to vector<32x1xf32>
    %cst_59 = arith.constant 7.812500e-03 : f32
    %147 = vector.broadcast %cst_59 : f32 to vector<32x1xf32>
    %148 = arith.mulf %143, %147 : vector<32x1xf32>
    %cst_60 = arith.constant 7.812500e-03 : f32
    %149 = vector.broadcast %cst_60 : f32 to vector<32x1xf32>
    %150 = arith.mulf %146, %149 : vector<32x1xf32>
    %151 = arith.mulf %148, %148 : vector<32x1xf32>
    %152 = arith.subf %150, %151 : vector<32x1xf32>
    %cst_61 = arith.constant 9.99999974E-6 : f32
    %153 = vector.broadcast %cst_61 : f32 to vector<32x1xf32>
    %154 = arith.addf %152, %153 : vector<32x1xf32>
    %155 = math.rsqrt %154 : vector<32x1xf32>
    %156 = vector.broadcast %148 : vector<32x1xf32> to vector<32x128xf32>
    %157 = arith.subf %141, %156 : vector<32x128xf32>
    %158 = vector.broadcast %155 : vector<32x1xf32> to vector<32x128xf32>
    %159 = arith.mulf %157, %158 : vector<32x128xf32>
    %c704 = arith.constant 704 : index
    %c0_62 = arith.constant 0 : index
    %160 = vector.load %arg3[%c704, %c0_62] : memref<1112x128xf32, #tpu.memory_space<vmem>>, vector<128x128xf32>
    %cst_63 = arith.constant dense<0.000000e+00> : vector<32x128xf32>
    %161 = tpu.matmul %159, %160, %cst_63 {dimension_numbers = #tpu.dot_dimension_numbers<[1], [0], [0], [1], [0, 0, 1, 1], [], []>} : vector<32x128xf32>, vector<128x128xf32>, vector<32x128xf32> -> vector<32x128xf32>
    %c832 = arith.constant 832 : index
    %c0_64 = arith.constant 0 : index
    %162 = vector.load %arg3[%c832, %c0_64] : memref<1112x128xf32, #tpu.memory_space<vmem>>, vector<1x128xf32>
    %163 = vector.broadcast %162 : vector<1x128xf32> to vector<32x128xf32>
    %164 = arith.addf %161, %163 : vector<32x128xf32>
    %cst_65 = arith.constant 5.000000e-01 : f32
    %165 = vector.broadcast %cst_65 : f32 to vector<32x128xf32>
    %166 = arith.mulf %165, %164 : vector<32x128xf32>
    %cst_66 = arith.constant 4.471500e-02 : f32
    %167 = vector.broadcast %cst_66 : f32 to vector<32x128xf32>
    %168 = arith.mulf %167, %164 : vector<32x128xf32>
    %169 = arith.mulf %168, %164 : vector<32x128xf32>
    %170 = arith.mulf %169, %164 : vector<32x128xf32>
    %171 = arith.addf %164, %170 : vector<32x128xf32>
    %cst_67 = arith.constant 0.797884583 : f32
    %172 = vector.broadcast %cst_67 : f32 to vector<32x128xf32>
    %173 = arith.mulf %172, %171 : vector<32x128xf32>
    %174 = math.tanh %173 : vector<32x128xf32>
    %cst_68 = arith.constant 1.000000e+00 : f32
    %175 = vector.broadcast %cst_68 : f32 to vector<32x128xf32>
    %176 = arith.addf %175, %174 : vector<32x128xf32>
    %177 = arith.mulf %166, %176 : vector<32x128xf32>
    %c840 = arith.constant 840 : index
    %c0_69 = arith.constant 0 : index
    %178 = vector.load %arg3[%c840, %c0_69] : memref<1112x128xf32, #tpu.memory_space<vmem>>, vector<128x128xf32>
    %cst_70 = arith.constant dense<0.000000e+00> : vector<32x128xf32>
    %179 = tpu.matmul %177, %178, %cst_70 {dimension_numbers = #tpu.dot_dimension_numbers<[1], [0], [0], [1], [0, 0, 1, 1], [], []>} : vector<32x128xf32>, vector<128x128xf32>, vector<32x128xf32> -> vector<32x128xf32>
    %180 = arith.addf %141, %179 : vector<32x128xf32>
    %c968 = arith.constant 968 : index
    %c0_71 = arith.constant 0 : index
    %181 = vector.load %arg3[%c968, %c0_71] : memref<1112x128xf32, #tpu.memory_space<vmem>>, vector<1x128xf32>
    %182 = vector.broadcast %181 : vector<1x128xf32> to vector<32x128xf32>
    %183 = arith.addf %180, %182 : vector<32x128xf32>
    %cst_72 = arith.constant dense<0.000000e+00> : vector<32xf32>
    %184 = vector.multi_reduction <add>, %183, %cst_72 [1] : vector<32x128xf32> to vector<32xf32>
    %185 = vector.shape_cast %184 : vector<32xf32> to vector<32x1xf32>
    %186 = arith.mulf %183, %183 : vector<32x128xf32>
    %cst_73 = arith.constant dense<0.000000e+00> : vector<32xf32>
    %187 = vector.multi_reduction <add>, %186, %cst_73 [1] : vector<32x128xf32> to vector<32xf32>
    %188 = vector.shape_cast %187 : vector<32xf32> to vector<32x1xf32>
    %cst_74 = arith.constant 7.812500e-03 : f32
    %189 = vector.broadcast %cst_74 : f32 to vector<32x1xf32>
    %190 = arith.mulf %185, %189 : vector<32x1xf32>
    %cst_75 = arith.constant 7.812500e-03 : f32
    %191 = vector.broadcast %cst_75 : f32 to vector<32x1xf32>
    %192 = arith.mulf %188, %191 : vector<32x1xf32>
    %193 = arith.mulf %190, %190 : vector<32x1xf32>
    %194 = arith.subf %192, %193 : vector<32x1xf32>
    %cst_76 = arith.constant 9.99999974E-6 : f32
    %195 = vector.broadcast %cst_76 : f32 to vector<32x1xf32>
    %196 = arith.addf %194, %195 : vector<32x1xf32>
    %197 = math.rsqrt %196 : vector<32x1xf32>
    %198 = vector.broadcast %190 : vector<32x1xf32> to vector<32x128xf32>
    %199 = arith.subf %183, %198 : vector<32x128xf32>
    %200 = vector.broadcast %197 : vector<32x1xf32> to vector<32x128xf32>
    %201 = arith.mulf %199, %200 : vector<32x128xf32>
    %c976 = arith.constant 976 : index
    %c0_77 = arith.constant 0 : index
    %202 = vector.load %arg3[%c976, %c0_77] : memref<1112x128xf32, #tpu.memory_space<vmem>>, vector<128x128xf32>
    %cst_78 = arith.constant dense<0.000000e+00> : vector<32x128xf32>
    %203 = tpu.matmul %201, %202, %cst_78 {dimension_numbers = #tpu.dot_dimension_numbers<[1], [0], [0], [1], [0, 0, 1, 1], [], []>} : vector<32x128xf32>, vector<128x128xf32>, vector<32x128xf32> -> vector<32x128xf32>
    %c1104 = arith.constant 1104 : index
    %c0_79 = arith.constant 0 : index
    %204 = vector.load %arg3[%c1104, %c0_79] : memref<1112x128xf32, #tpu.memory_space<vmem>>, vector<1x128xf32>
    %205 = vector.broadcast %204 : vector<1x128xf32> to vector<32x128xf32>
    %206 = arith.addf %203, %205 : vector<32x128xf32>
    %c0_80 = arith.constant 0 : index
    %c0_81 = arith.constant 0 : index
    %207 = vector.load %arg4[%c0_80, %c0_81] : memref<32x128xf32, #tpu.memory_space<vmem>>, vector<32x128xf32>
    tpu.vector_store %arg4[%c0_80, %c0_81], %206 {strides = array<i32>} : memref<32x128xf32, #tpu.memory_space<vmem>>, vector<32x128xf32>,
    return
  }
}

</mosaic_0001>

<bundles_post_ra>
// kernel: tpu_custom_call.1
= control target key start
LH: loop header
LB: loop body
LE: loop exit
PB: predicated region body
PF: predicated region fallthrough
CT: control target
= control target key end

     0   :  { %9 = vsyncpa [#allocation3], 0  ;;  %s3415_s0 = inlined_call_operand.vmem [shape: f32[16,8], index: 0, kind: input, shape index: {}]   ;;  %s3416_s1 = inlined_call_operand.vmem [shape: f32[32,16], index: 1, kind: input, shape index: {}]   ;;  %s3417_s2 = inlined_call_operand.vmem [shape: f32[256,32], index: 2, kind: input, shape index: {}]   ;;  %s3418_s3 = inlined_call_operand.hbm [shape: f32[1112,128], index: 3, kind: input, shape index: {}]   ;;  %s3419_s4 = inlined_call_operand.hbm [shape: f32[32,128], index: 4, kind: output, shape index: {}]  }
   0x1   :  { %10 = vsyncpa [#allocation4], 0  ;;  %s2850_s15 = smov [#allocation2]  }
   0x2   :  { %s22_s16 = sshll.u32 %s2850_s15, 4  ;;  %s23_s16 = int_to_ptr.vmem [resolvable:$true] %s22_s16 }
   0x3   :  { %s2814_s17 = scalar_lea.vmem %s23_s16, 17792  ;;  %p2819_p1 = scmp.lt.s32.totalorder %s23_s16, %s23_s16 }
   0x4   :  { %p2815_p0 = scmp.ne.s32.totalorder %s23_s16, %s2814_s17  ;;  %p2820_p2 = scmp.lt.s32.totalorder %s2814_s17, %s2814_s17 }
   0x6   :  { %p2821_p3 = por %p2820_p2, %p2819_p1 }
   0x8   :  { %p2822_p4 = pnand %p2821_p3, %p2815_p0 }
   0xa   :  { %2825 = shalt.err (!%p2822_p4)
}
   0xb   :  { %s2851_s18 = smov 128   ;;  %s2852_s19 = smov 8  }
   0xc   :  { %28 = dma.hbm_to_vmem [thread:$0]  %s3418_s3, 17792, %s23_s16, [#allocation3], %s2851_s18, %s2851_s18, %s2852_s19  }
   0xd   :  { %2846 = dma.done.wait [#allocation3], 17792  }
   0xe   :  { %2847 = vsyncadd [#allocation3], 4294949504  ;;  %vm39_vm0 = vcmask 64512   ;;  %v38_v0 = vld [vmem:[#allocation2] sm:$0xff]  ;;  %v33_v2 = vld [vmem:[%s3415_s0 + $0x8] sm:$0xff]  ;;  %vm126_vm1 = vcmask 130048  }
   0xf   :  { %v32_v1 = vld [vmem:[%s3415_s0] sm:$0xff]  ;;  %2337 = vmatprep.subr.mxu0 %v38_v0  ;;  %v35_v6 = vld [vmem:[%s3416_s1 + $0x8] sm:$0xff]  ;;  %v36_v7 = vld [vmem:[%s3416_s1 + $0x10] sm:$0xff]  ;;  %vm326_vm2 = vcmask 261120  }
  0x10   :  { %2339 = vmatprep.mubr.msk.f32.mxu0 %vm39_vm0, %v32_v1  ;;  %2338 = vmatpush3.msra.mxu0 %v38_v0  ;;  %v34_v3 = vld [vmem:[%s3416_s1] sm:$0xff]  ;;  %v37_v8 = vld [vmem:[%s3416_s1 + $0x18] sm:$0xff]  ;;  %v2102_v9 = vld [vmem:[#allocation2 + $0x8] ss:$0 sm:$0xff] }
  0x11   :  { %2340 = vmatmul.mubr.msk.f32.vlgmr.msra.gmra.mxu0 %vm39_vm0, %v33_v2  ;;  %v294_v22 = vld [vmem:[%s3417_s2] sm:$0xff]  ;;  %v2107_v53 = vld [vmem:[#allocation2 + $0x10] ss:$0 sm:$0xff]  ;;  %v2108_v55 = vld [vmem:[#allocation2 + $0x18] ss:$0 sm:$0xff] }
  0x12   :  { %2346 = vmatprep.mubr.msk.f32.mxu0 %vm126_vm1, %v34_v3 }
  0xd1   :  { %v2341_v4 = vpop.f32.mrf.mxu0 }
  0xd2   :  { %2342 = vmatprep.subr.mxu0 %v2341_v4 }
  0xd3   :  { %v112_v5 = vpop.f32.mrf.mxu0  ;;  %2343 = vmatpush3.msra.mxu0 %v2341_v4 }
  0xd4   :  { %2344 = vmatprep.subr.mxu0 %v112_v5 }
  0xd5   :  { %2345 = vmatpush3.msra.mxu0 %v112_v5 }
  0xd6   :  { %2347 = vmatmul.mubr.msk.f32.vlgmr.msra.gmra.mxu0 %vm126_vm1, %v35_v6 }
  0xd7   :  { %2349 = vmatprep.mubr.msk.f32.mxu0 %vm126_vm1, %v36_v7 }
  0xda   :  { %2350 = vmatmul.mubr.msk.f32.gmra.mxu0 %vm126_vm1, %v37_v8 }
  0xdb   :  { %2360 = vmatprep.mubr.msk.f32.mxu0 %vm326_vm2, %v294_v22  ;;  %v304_v22 = vld [vmem:[%s3417_s2 + $0x50] sm:$0xff] }
 0x196   :  { %v2348_v10 = vpop.f32.mrf.mxu0 }
 0x197   :  { %v2903_v11 = vadd.f32 %v2348_v10, %v2102_v9  ;;  %v296_v10 = vld [vmem:[%s3417_s2 + $0x10] sm:$0xff] }
 0x198   :  { %v205_v12 = vpop.f32.mrf.mxu0 }
 0x199   :  { %226 = vadd.xlane.f32.xlu1 %v2903_v11  ;;  %v2913_v18 = vadd.f32 %v2102_v9, %v205_v12  ;;  %v233_v21 = vmul.f32 %v2903_v11, %v2903_v11  ;;  %v297_v12 = vld [vmem:[%s3417_s2 + $0x18] sm:$0xff] }
 0x19a   :  { %v2351_v13 = vpop.f32.mrf.mxu0 }
 0x19b   :  { %v2906_v14 = vadd.f32 %v2351_v13, %v2102_v9  ;;  %v232_v20 = vmul.f32 %v2913_v18, %v2913_v18  ;;  %v298_v13 = vld [vmem:[%s3417_s2 + $0x20] sm:$0xff] }
 0x19c   :  { %v215_v15 = vpop.f32.mrf.mxu0 }
 0x19d   :  { %230 = vadd.xlane.f32.xlu0 %v2906_v14  ;;  %v235_v16 = vmul.f32 %v2906_v14, %v2906_v14  ;;  %v2911_v17 = vadd.f32 %v2102_v9, %v215_v15  ;;  %v295_v9 = vld [vmem:[%s3417_s2 + $0x8] sm:$0xff] }
 0x19e   :  { %v299_v15 = vld [vmem:[%s3417_s2 + $0x28] sm:$0xff] }
 0x19f   :  { %242 = vadd.xlane.f32.xlu1 %v235_v16  ;;  %v234_v19 = vmul.f32 %v2911_v17, %v2911_v17  ;;  %v300_v16 = vld [vmem:[%s3417_s2 + $0x30] sm:$0xff] }
 0x1a1   :  { %228 = vadd.xlane.f32.xlu0 %v2911_v17 }
 0x1a3   :  { %224 = vadd.xlane.f32.xlu1 %v2913_v18 }
 0x1a5   :  { %240 = vadd.xlane.f32.xlu0 %v234_v19  ;;  %v301_v19 = vld [vmem:[%s3417_s2 + $0x38] sm:$0xff] }
 0x1a7   :  { %236 = vadd.xlane.f32.xlu1 %v232_v20  ;;  %v302_v20 = vld [vmem:[%s3417_s2 + $0x40] sm:$0xff] }
 0x1a9   :  { %238 = vadd.xlane.f32.xlu0 %v233_v21  ;;  %v303_v21 = vld [vmem:[%s3417_s2 + $0x48] sm:$0xff] }
 0x222   :  { %v227_v23 = vpop.xlane.xlu1 %226 }
 0x223   :  { %v245_v36 = vmul.f32 0.0078125, %v227_v23  ;;  %v305_v23 = vld [vmem:[%s3417_s2 + $0x58] sm:$0xff] }
 0x225   :  { %v253_v44 = vmul.f32 %v245_v36, %v245_v36  ;;  %v269_v63 = vsub.f32 %v2903_v11, %v245_v36 }
 0x226   :  { %v231_v24 = vpop.xlane.xlu0 %230 }
 0x227   :  { %v247_v25 = vmul.f32 0.0078125, %v231_v24  ;;  %v306_v24 = vld [vmem:[%s3417_s2 + $0x60] sm:$0xff] }
 0x228   :  { %v243_v26 = vpop.xlane.xlu1 %242 }
 0x229   :  { %v255_v27 = vmul.f32 %v247_v25, %v247_v25  ;;  %v251_v28 = vmul.f32 0.0078125, %v243_v26  ;;  %v271_v51 = vsub.f32 %v2906_v14, %v247_v25  ;;  %v307_v25 = vld [vmem:[%s3417_s2 + $0x68] sm:$0xff]  ;;  %v308_v26 = vld [vmem:[%s3417_s2 + $0x70] sm:$0xff] }
 0x22a   :  { %v229_v29 = vpop.xlane.xlu0 %228 }
 0x22b   :  { %v259_v30 = vsub.f32 %v251_v28, %v255_v27  ;;  %v246_v31 = vmul.f32 0.0078125, %v229_v29  ;;  %v309_v27 = vld [vmem:[%s3417_s2 + $0x78] sm:$0xff]  ;;  %v664_v28 = vld [vmem:[#allocation2 + $0xa0] sm:$0xff] }
 0x22c   :  { %v225_v32 = vpop.xlane.xlu1 %224  ;;  %2416 = vmatprep.mubr.f32.mxu1 %v664_v28 }
 0x22d   :  { %v263_v33 = vadd.f32 1e-05, %v259_v30  ;;  %v244_v34 = vmul.f32 0.0078125, %v225_v32  ;;  %v254_v37 = vmul.f32 %v246_v31, %v246_v31  ;;  %v270_v57 = vsub.f32 %v2911_v17, %v246_v31 }
 0x22e   :  { %v241_v35 = vpop.xlane.xlu0 %240 }
 0x22f   :  { %2686 = vrsqrt.f32 %v263_v33  ;;  %v250_v38 = vmul.f32 0.0078125, %v241_v35  ;;  %v252_v40 = vmul.f32 %v244_v34, %v244_v34  ;;  %v268_v60 = vsub.f32 %v2913_v18, %v244_v34 }
 0x230   :  { %v237_v39 = vpop.xlane.xlu1 %236 }
 0x231   :  { %v258_v41 = vsub.f32 %v250_v38, %v254_v37  ;;  %v248_v42 = vmul.f32 0.0078125, %v237_v39  ;;  %v321_v39 = vld [vmem:[#allocation2 + $0x78] sm:$0xff] }
 0x232   :  { %v239_v43 = vpop.xlane.xlu0 %238 }
 0x233   :  { %v262_v45 = vadd.f32 1e-05, %v258_v41  ;;  %v256_v46 = vsub.f32 %v248_v42, %v252_v40  ;;  %v249_v47 = vmul.f32 0.0078125, %v239_v43  ;;  %v320_v41 = vld [vmem:[#allocation2 + $0x70] sm:$0xff]  ;;  %v319_v42 = vld [vmem:[#allocation2 + $0x68] sm:$0xff] }
 0x235   :  { %2688 = vrsqrt.f32 %v262_v45  ;;  %v260_v48 = vadd.f32 1e-05, %v256_v46  ;;  %v257_v49 = vsub.f32 %v249_v47, %v253_v44  ;;  %v323_v45 = vld [vmem:[#allocation2 + $0x88] sm:$0xff]  ;;  %v318_v46 = vld [vmem:[#allocation2 + $0x60] sm:$0xff] }
 0x237   :  { %2690 = vrsqrt.f32 %v260_v48  ;;  %v261_v50 = vadd.f32 1e-05, %v257_v49 }
 0x239   :  { %2692 = vrsqrt.f32 %v261_v50  ;;  %v322_v50 = vld [vmem:[#allocation2 + $0x80] sm:$0xff] }
 0x23c   :  { %v2687_v52 = vpop.eup %2686 }
 0x23d   :  { %v275_v54 = vmul.f32 %v2687_v52, %v271_v51  ;;  %v317_v51 = vld [vmem:[#allocation2 + $0x58] sm:$0xff] }
 0x23f   :  { %v284_v56 = vmul.f32 %v2107_v53, %v275_v54 }
 0x241   :  { %v293_v58 = vadd.f32 %v2108_v55, %v284_v56  ;;  %v325_v56 = vld [vmem:[#allocation2 + $0x98] sm:$0xff] }
 0x242   :  { %v2689_v59 = vpop.eup %2688 }
 0x243   :  { %2352 = vmatprep.subr.mxu0 %v293_v58  ;;  %v274_v61 = vmul.f32 %v2689_v59, %v270_v57  ;;  %v311_v57 = vld [vmem:[#allocation2 + $0x28] sm:$0xff] }
 0x244   :  { %v2691_v62 = vpop.eup %2690  ;;  %2353 = vmatpush3.msra.mxu0 %v293_v58  ;;  %v316_v58 = vld [vmem:[#allocation2 + $0x50] sm:$0xff] }
 0x245   :  { %v283_v0 = vmul.f32 %v2107_v53, %v274_v61  ;;  %v272_v1 = vmul.f32 %v2691_v62, %v268_v60 }
 0x246   :  { %v2693_v2 = vpop.eup %2692 }
 0x247   :  { %v292_v3 = vadd.f32 %v2108_v55, %v283_v0  ;;  %v273_v4 = vmul.f32 %v2693_v2, %v269_v63  ;;  %v281_v6 = vmul.f32 %v2107_v53, %v272_v1  ;;  %v324_v1 = vld [vmem:[#allocation2 + $0x90] sm:$0xff]  ;;  %v315_v2 = vld [vmem:[#allocation2 + $0x48] sm:$0xff] }
 0x249   :  { %2354 = vmatprep.subr.mxu0 %v292_v3  ;;  %v282_v5 = vmul.f32 %v2107_v53, %v273_v4  ;;  %v290_v8 = vadd.f32 %v2108_v55, %v281_v6 }
 0x24a   :  { %2355 = vmatpush3.msra.mxu0 %v292_v3 }
 0x24b   :  { %v291_v7 = vadd.f32 %v2108_v55, %v282_v5 }
 0x24d   :  { %2356 = vmatprep.subr.mxu0 %v291_v7 }
 0x24e   :  { %2357 = vmatpush3.msra.mxu0 %v291_v7 }
 0x24f   :  { %2358 = vmatprep.subr.mxu0 %v290_v8 }
 0x250   :  { %2359 = vmatpush3.msra.mxu0 %v290_v8 }
 0x251   :  { %2361 = vmatmul.mubr.msk.f32.vlgmr.msra.gmra.mxu0 %vm326_vm2, %v295_v9 }
 0x252   :  { %2363 = vmatprep.mubr.msk.f32.mxu0 %vm326_vm2, %v296_v10 }
 0x255   :  { %2364 = vmatmul.mubr.msk.f32.gmra.mxu0 %vm326_vm2, %v297_v12  ;;  %v314_v12 = vld [vmem:[#allocation2 + $0x40] sm:$0xff] }
 0x256   :  { %2366 = vmatprep.mubr.msk.f32.mxu0 %vm326_vm2, %v298_v13 }
 0x259   :  { %2367 = vmatmul.mubr.msk.f32.gmra.mxu0 %vm326_vm2, %v299_v15 }
 0x25a   :  { %2369 = vmatprep.mubr.msk.f32.mxu0 %vm326_vm2, %v300_v16 }
 0x25d   :  { %2370 = vmatmul.mubr.msk.f32.gmra.mxu0 %vm326_vm2, %v301_v19 }
 0x25e   :  { %2372 = vmatprep.mubr.msk.f32.mxu0 %vm326_vm2, %v302_v20 }
 0x261   :  { %2373 = vmatmul.mubr.msk.f32.gmra.mxu0 %vm326_vm2, %v303_v21 }
 0x262   :  { %2375 = vmatprep.mubr.msk.f32.mxu0 %vm326_vm2, %v304_v22 }
 0x265   :  { %2376 = vmatmul.mubr.msk.f32.gmra.mxu0 %vm326_vm2, %v305_v23 }
 0x266   :  { %2378 = vmatprep.mubr.msk.f32.mxu0 %vm326_vm2, %v306_v24  ;;  %v313_v24 = vld [vmem:[#allocation2 + $0x38] sm:$0xff] }
 0x269   :  { %2379 = vmatmul.mubr.msk.f32.gmra.mxu0 %vm326_vm2, %v307_v25 }
 0x26a   :  { %2381 = vmatprep.mubr.msk.f32.mxu0 %vm326_vm2, %v308_v26 }
 0x26d   :  { %2382 = vmatmul.mubr.msk.f32.gmra.mxu0 %vm326_vm2, %v309_v27 }
 0x311   :  { %v2362_v29 = vpop.f32.mrf.mxu0 }
 0x312   :  { %v3020_v7 = vadd.f32 %v2362_v29, %v311_v57  ;;  %v310_v57 = vld [vmem:[#allocation2 + $0x20] sm:$0xff] }
 0x313   :  { %v2991_v30 = vpop.f32.mrf.mxu0 }
 0x315   :  { %v2993_v31 = vpop.f32.mrf.mxu0 }
 0x317   :  { %v2995_v32 = vpop.f32.mrf.mxu0 }
 0x319   :  { %v2368_v33 = vpop.f32.mrf.mxu0 }
 0x31a   :  { %v3030_v20 = vadd.f32 %v2368_v33, %v315_v2 }
 0x31b   :  { %v461_v34 = vpop.f32.mrf.mxu0 }
 0x31c   :  { %v3039_v29 = vadd.f32 %v461_v34, %v314_v12  ;;  %v541_v34 = vmul.f32 0.044715, %v3030_v20 }
 0x31d   :  { %v2371_v35 = vpop.f32.mrf.mxu0 }
 0x31e   :  { %v3012_v62 = vadd.f32 %v2371_v35, %v317_v51 }
 0x31f   :  { %v471_v36 = vpop.f32.mrf.mxu0 }
 0x320   :  { %v3022_v8 = vadd.f32 %v471_v36, %v316_v58  ;;  %v543_v21 = vmul.f32 0.044715, %v3012_v62 }
 0x321   :  { %v2374_v37 = vpop.f32.mrf.mxu0 }
 0x322   :  { %v3001_v48 = vadd.f32 %v2374_v37, %v319_v42  ;;  %v542_v33 = vmul.f32 0.044715, %v3022_v8  ;;  %v312_v37 = vld [vmem:[#allocation2 + $0x30] sm:$0xff]  ;;  %v3049_v42 = vadd.f32 %v2993_v31, %v313_v24 }
 0x323   :  { %v481_v38 = vpop.f32.mrf.mxu0 }
 0x324   :  { %v3006_v54 = vadd.f32 %v481_v38, %v318_v46  ;;  %v545_v63 = vmul.f32 0.044715, %v3001_v48  ;;  %v558_v31 = vmul.f32 %v542_v33, %v3022_v8 }
 0x325   :  { %v2377_v40 = vpop.f32.mrf.mxu0 }
 0x326   :  { %v2997_v43 = vadd.f32 %v2377_v40, %v321_v39  ;;  %v544_v9 = vmul.f32 0.044715, %v3006_v54  ;;  %v561_v22 = vmul.f32 %v545_v63, %v3001_v48 }
 0x327   :  { %v491_v44 = vpop.f32.mrf.mxu0 }
 0x328   :  { %v2999_v47 = vadd.f32 %v491_v44, %v320_v41  ;;  %v547_v52 = vmul.f32 0.044715, %v2997_v43  ;;  %v560_v35 = vmul.f32 %v544_v9, %v3006_v54  ;;  %v559_v44 = vmul.f32 %v543_v21, %v3012_v62 }
 0x329   :  { %v2380_v49 = vpop.f32.mrf.mxu0  ;;  %v577_v51 = vmul.f32 %v561_v22, %v3001_v48 }
 0x32a   :  { %v3004_v53 = vadd.f32 %v2380_v49, %v323_v45  ;;  %v546_v59 = vmul.f32 0.044715, %v2999_v47  ;;  %v563_v3 = vmul.f32 %v547_v52, %v2997_v43  ;;  %v3058_v52 = vadd.f32 %v2995_v32, %v312_v37 }
 0x32b   :  { %v501_v55 = vpop.f32.mrf.mxu0  ;;  %v576_v63 = vmul.f32 %v560_v35, %v3006_v54  ;;  %v575_v32 = vmul.f32 %v559_v44, %v3012_v62 }
 0x32c   :  { %v549_v60 = vmul.f32 0.044715, %v3004_v53  ;;  %v3010_v61 = vadd.f32 %v501_v55, %v322_v50  ;;  %v562_v13 = vmul.f32 %v546_v59, %v2999_v47  ;;  %v579_v28 = vmul.f32 %v563_v3, %v2997_v43 }
 0x32d   :  { %v2383_v0 = vpop.f32.mrf.mxu0  ;;  %v540_v55 = vmul.f32 0.044715, %v3039_v29  ;;  %v538_v9 = vmul.f32 0.044715, %v3058_v52 }
 0x32e   :  { %v565_v4 = vmul.f32 %v549_v60, %v3004_v53  ;;  %v548_v5 = vmul.f32 0.044715, %v3010_v61  ;;  %v3018_v6 = vadd.f32 %v2383_v0, %v325_v56  ;;  %v578_v41 = vmul.f32 %v562_v13, %v2999_v47 }
 0x32f   :  { %v511_v10 = vpop.f32.mrf.mxu0  ;;  %v595_v50 = vadd.f32 %v579_v28, %v2997_v43  ;;  %v539_v0 = vmul.f32 0.044715, %v3049_v42  ;;  %v592_v13 = vadd.f32 %v576_v63, %v3006_v54 }
 0x330   :  { %v564_v15 = vmul.f32 %v548_v5, %v3010_v61  ;;  %v551_v16 = vmul.f32 0.044715, %v3018_v6  ;;  %v3028_v19 = vadd.f32 %v511_v10, %v324_v1  ;;  %v581_v23 = vmul.f32 %v565_v4, %v3004_v53 }
 0x331   :  { %v594_v60 = vadd.f32 %v578_v41, %v2999_v47  ;;  %v557_v1 = vmul.f32 %v541_v34, %v3030_v20  ;;  %v611_v3 = vmul.f32 0.7978846, %v595_v50  ;;  %v593_v4 = vadd.f32 %v577_v51, %v3001_v48 }
 0x332   :  { %v550_v25 = vmul.f32 0.044715, %v3028_v19  ;;  %v567_v26 = vmul.f32 %v551_v16, %v3018_v6  ;;  %v580_v27 = vmul.f32 %v564_v15, %v3010_v61  ;;  %v597_v36 = vadd.f32 %v581_v23, %v3004_v53 }
 0x333   :  { %v3070_v5 = vadd.f32 %v2991_v30, %v310_v57  ;;  %v556_v10 = vmul.f32 %v540_v55, %v3039_v29  ;;  %v610_v12 = vmul.f32 0.7978846, %v594_v60  ;;  %v574_v15 = vmul.f32 %v558_v31, %v3022_v8 }
 0x334   :  { %v566_v38 = vmul.f32 %v550_v25, %v3028_v19  ;;  %v583_v39 = vmul.f32 %v567_v26, %v3018_v6  ;;  %v596_v40 = vadd.f32 %v580_v27, %v3010_v61  ;;  %v613_v45 = vmul.f32 0.7978846, %v597_v36 }
 0x335   :  { %v537_v16 = vmul.f32 0.044715, %v3020_v7  ;;  %v555_v21 = vmul.f32 %v539_v0, %v3049_v42  ;;  %v573_v22 = vmul.f32 %v557_v1, %v3030_v20  ;;  %v609_v30 = vmul.f32 0.7978846, %v593_v4 }
 0x336   :  { %v599_v46 = vadd.f32 %v583_v39, %v3018_v6  ;;  %v582_v49 = vmul.f32 %v566_v38, %v3028_v19  ;;  %v612_v56 = vmul.f32 0.7978846, %v596_v40  ;;  %2694 = vtanh.f32 %v613_v45 }
 0x337   :  { %v591_v23 = vadd.f32 %v575_v32, %v3012_v62  ;;  %v536_v24 = vmul.f32 0.044715, %v3070_v5  ;;  %v554_v25 = vmul.f32 %v538_v9, %v3058_v52  ;;  %v608_v26 = vmul.f32 0.7978846, %v592_v13 }
 0x338   :  { %v615_v58 = vmul.f32 0.7978846, %v599_v46  ;;  %v598_v59 = vadd.f32 %v582_v49, %v3028_v19  ;;  %v590_v27 = vadd.f32 %v574_v15, %v3022_v8  ;;  %v572_v28 = vmul.f32 %v556_v10, %v3039_v29 }
 0x339   :  { %v553_v33 = vmul.f32 %v537_v16, %v3020_v7  ;;  %v589_v35 = vadd.f32 %v573_v22, %v3030_v20  ;;  %v571_v36 = vmul.f32 %v555_v21, %v3049_v42  ;;  %v607_v37 = vmul.f32 0.7978846, %v591_v23 }
 0x33a   :  { %2696 = vtanh.f32 %v615_v58  ;;  %v614_v2 = vmul.f32 0.7978846, %v598_v59  ;;  %v552_v38 = vmul.f32 %v536_v24, %v3070_v5  ;;  %v570_v39 = vmul.f32 %v554_v25, %v3058_v52 }
 0x33b   :  { %2698 = vtanh.f32 %v612_v56  ;;  %v606_v40 = vmul.f32 0.7978846, %v590_v27  ;;  %v588_v41 = vadd.f32 %v572_v28, %v3039_v29  ;;  %v605_v34 = vmul.f32 0.7978846, %v589_v35 }
 0x33c   :  { %2700 = vtanh.f32 %v614_v2  ;;  %v587_v44 = vadd.f32 %v571_v36, %v3049_v42  ;;  %v569_v45 = vmul.f32 %v553_v33, %v3020_v7  ;;  %v586_v50 = vadd.f32 %v570_v39, %v3058_v52 }
 0x33d   :  { %2702 = vtanh.f32 %v611_v3  ;;  %v568_v51 = vmul.f32 %v552_v38, %v3070_v5  ;;  %v535_v31 = vmul.f32 0.5, %v3018_v6  ;;  %v604_v57 = vmul.f32 0.7978846, %v588_v41 }
 0x33e   :  { %2704 = vtanh.f32 %v610_v12  ;;  %v603_v59 = vmul.f32 0.7978846, %v587_v44  ;;  %v585_v60 = vadd.f32 %v569_v45, %v3020_v7  ;;  %v534_v0 = vmul.f32 0.5, %v3028_v19 }
 0x33f   :  { %2706 = vtanh.f32 %v609_v30  ;;  %v602_v3 = vmul.f32 0.7978846, %v586_v50  ;;  %v584_v4 = vadd.f32 %v568_v51, %v3070_v5  ;;  %v533_v6 = vmul.f32 0.5, %v3004_v53 }
 0x340   :  { %2708 = vtanh.f32 %v608_v26  ;;  %v601_v13 = vmul.f32 0.7978846, %v585_v60  ;;  %v532_v16 = vmul.f32 0.5, %v3010_v61  ;;  %v531_v23 = vmul.f32 0.5, %v2997_v43 }
 0x341   :  { %2710 = vtanh.f32 %v607_v37  ;;  %v600_v22 = vmul.f32 0.7978846, %v584_v4  ;;  %v530_v26 = vmul.f32 0.5, %v2999_v47  ;;  %v529_v33 = vmul.f32 0.5, %v3001_v48  ;;  %v666_v4 = vld [vmem:[#allocation2 + $0xb0] sm:$0xff] }
 0x342   :  { %2712 = vtanh.f32 %v606_v40  ;;  %v528_v38 = vmul.f32 0.5, %v3006_v54  ;;  %v527_v40 = vmul.f32 0.5, %v3012_v62  ;;  %v526_v44 = vmul.f32 0.5, %v3022_v8 }
 0x343   :  { %v2695_v46 = vpop.eup %2694  ;;  %2714 = vtanh.f32 %v605_v34  ;;  %v525_v54 = vmul.f32 0.5, %v3030_v20  ;;  %v524_v62 = vmul.f32 0.5, %v3039_v29  ;;  %v523_v8 = vmul.f32 0.5, %v3049_v42 }
 0x344   :  { %v645_v32 = vadd.f32 1.0, %v2695_v46  ;;  %2716 = vtanh.f32 %v604_v57  ;;  %v522_v20 = vmul.f32 0.5, %v3058_v52  ;;  %v521_v29 = vmul.f32 0.5, %v3020_v7  ;;  %v667_v52 = vld [vmem:[#allocation2 + $0xb8] sm:$0xff]  ;;  %v831_v7 = vld [vmem:[#allocation2 + $0x150] sm:$0xff] }
 0x345   :  { %2718 = vtanh.f32 %v603_v59 }
 0x346   :  { %v661_v15 = vmul.f32 %v645_v32, %v533_v6  ;;  %2720 = vtanh.f32 %v602_v3  ;;  %v665_v3 = vld [vmem:[#allocation2 + $0xa8] sm:$0xff] }
 0x347   :  { %v2697_v49 = vpop.eup %2696  ;;  %2722 = vtanh.f32 %v601_v13  ;;  %v757_v13 = vld [vmem:[#allocation2 + $0xc0] sm:$0xff] }
 0x348   :  { %v2699_v55 = vpop.eup %2698  ;;  %v647_v56 = vadd.f32 1.0, %v2697_v49  ;;  %2724 = vtanh.f32 %v600_v22 }
 0x349   :  { %v2701_v58 = vpop.eup %2700  ;;  %v644_v10 = vadd.f32 1.0, %v2699_v55 }
 0x34a   :  { %v663_v63 = vmul.f32 %v647_v56, %v535_v31  ;;  %v646_v1 = vadd.f32 1.0, %v2701_v58  ;;  %v2703_v2 = vpop.eup %2702 }
 0x34b   :  { %v2705_v12 = vpop.eup %2704  ;;  %v643_v19 = vadd.f32 1.0, %v2703_v2  ;;  %v660_v30 = vmul.f32 %v644_v10, %v532_v16  ;;  %v520_v2 = vmul.f32 0.5, %v3070_v5  ;;  %v758_v5 = vld [vmem:[#allocation2 + $0xc8] sm:$0xff] }
 0x34c   :  { %2384 = vmatprep.subr.mxu1 %v663_v63  ;;  %v662_v9 = vmul.f32 %v646_v1, %v534_v0  ;;  %v2707_v21 = vpop.eup %2706  ;;  %v642_v24 = vadd.f32 1.0, %v2705_v12 }
 0x34d   :  { %2385 = vmatpush3.msra.mxu1 %v663_v63  ;;  %v2709_v53 = vpop.eup %2708  ;;  %v659_v25 = vmul.f32 %v643_v19, %v531_v23  ;;  %v641_v27 = vadd.f32 1.0, %v2707_v21 }
 0x34e   :  { %2386 = vmatprep.subr.mxu1 %v662_v9  ;;  %v2711_v61 = vpop.eup %2710  ;;  %v658_v28 = vmul.f32 %v642_v24, %v530_v26  ;;  %v640_v35 = vadd.f32 1.0, %v2709_v53  ;;  %v759_v53 = vld [vmem:[#allocation2 + $0xd0] sm:$0xff] }
 0x34f   :  { %2387 = vmatpush3.msra.mxu1 %v662_v9  ;;  %v2713_v36 = vpop.eup %2712  ;;  %v657_v37 = vmul.f32 %v641_v27, %v529_v33  ;;  %v639_v39 = vadd.f32 1.0, %v2711_v61  ;;  %v832_v9 = vld [vmem:[#allocation2 + $0x158] sm:$0xff]  ;;  %v830_v27 = vld [vmem:[#allocation2 + $0x148] sm:$0xff]  ;;  %v829_v61 = vld [vmem:[#allocation2 + $0x140] sm:$0xff] }
 0x350   :  { %2388 = vmatprep.subr.mxu1 %v661_v15  ;;  %v2715_v43 = vpop.eup %2714  ;;  %v656_v47 = vmul.f32 %v640_v35, %v528_v38  ;;  %v638_v41 = vadd.f32 1.0, %v2713_v36  ;;  %2422 = vmatprep.subr.mxu0 %v832_v9  ;;  %v827_v33 = vld [vmem:[#allocation2 + $0x130] sm:$0xff]  ;;  %v826_v35 = vld [vmem:[#allocation2 + $0x128] sm:$0xff]  ;;  %v825_v36 = vld [vmem:[#allocation2 + $0x120] sm:$0xff] }
 0x351   :  { %2389 = vmatpush3.msra.mxu1 %v661_v15  ;;  %v2717_v34 = vpop.eup %2716  ;;  %v655_v48 = vmul.f32 %v639_v39, %v527_v40  ;;  %v637_v45 = vadd.f32 1.0, %v2715_v43  ;;  %2423 = vmatpush3.msra.mxu0 %v832_v9  ;;  %v824_v43 = vld [vmem:[#allocation2 + $0x118] sm:$0xff]  ;;  %v822_v38 = vld [vmem:[#allocation2 + $0x108] sm:$0xff]  ;;  %v821_v39 = vld [vmem:[#allocation2 + $0x100] sm:$0xff] }
 0x352   :  { %2390 = vmatprep.subr.mxu1 %v660_v30  ;;  %v2719_v46 = vpop.eup %2718  ;;  %v654_v49 = vmul.f32 %v638_v41, %v526_v44  ;;  %v636_v50 = vadd.f32 1.0, %v2717_v34  ;;  %2424 = vmatprep.subr.mxu0 %v831_v7  ;;  %v819_v40 = vld [vmem:[#allocation2 + $0xf0] sm:$0xff]  ;;  %v818_v41 = vld [vmem:[#allocation2 + $0xe8] sm:$0xff]  ;;  %v817_v34 = vld [vmem:[#allocation2 + $0xe0] sm:$0xff] }
 0x353   :  { %2391 = vmatpush3.msra.mxu1 %v660_v30  ;;  %v2721_v51 = vpop.eup %2720  ;;  %v653_v55 = vmul.f32 %v637_v45, %v525_v54  ;;  %v635_v31 = vadd.f32 1.0, %v2719_v46  ;;  %2425 = vmatpush3.msra.mxu0 %v831_v7 }
 0x354   :  { %2392 = vmatprep.subr.mxu1 %v659_v25  ;;  %v2723_v56 = vpop.eup %2722  ;;  %v652_v57 = vmul.f32 %v636_v50, %v524_v62  ;;  %v634_v58 = vadd.f32 1.0, %v2721_v51  ;;  %2426 = vmatprep.subr.mxu0 %v830_v27 }
 0x355   :  { %2393 = vmatpush3.msra.mxu1 %v659_v25  ;;  %v2725_v59 = vpop.eup %2724  ;;  %v651_v60 = vmul.f32 %v635_v31, %v523_v8  ;;  %v633_v63 = vadd.f32 1.0, %v2723_v56  ;;  %2427 = vmatpush3.msra.mxu0 %v830_v27  ;;  %v968_v27 = vld [vmem:[#allocation2 + $0x1b0] sm:$0xff] }
 0x356   :  { %2394 = vmatprep.subr.mxu1 %v658_v28  ;;  %v650_v0 = vmul.f32 %v634_v58, %v522_v20  ;;  %v632_v1 = vadd.f32 1.0, %v2725_v59  ;;  %2428 = vmatprep.subr.mxu0 %v829_v61 }
 0x357   :  { %2395 = vmatpush3.msra.mxu1 %v658_v28  ;;  %v649_v32 = vmul.f32 %v633_v63, %v521_v29  ;;  %2429 = vmatpush3.msra.mxu0 %v829_v61  ;;  %v828_v28 = vld [vmem:[#allocation2 + $0x138] sm:$0xff]  ;;  %v967_v61 = vld [vmem:[#allocation2 + $0x1a8] sm:$0xff] }
 0x358   :  { %2396 = vmatprep.subr.mxu1 %v657_v37  ;;  %v648_v42 = vmul.f32 %v632_v1, %v520_v2  ;;  %2430 = vmatprep.subr.mxu0 %v828_v28 }
 0x359   :  { %2397 = vmatpush3.msra.mxu1 %v657_v37  ;;  %2431 = vmatpush3.msra.mxu0 %v828_v28  ;;  %v823_v37 = vld [vmem:[#allocation2 + $0x110] sm:$0xff]  ;;  %v966_v28 = vld [vmem:[#allocation2 + $0x1a0] sm:$0xff] }
 0x35a   :  { %2398 = vmatprep.subr.mxu1 %v656_v47  ;;  %2432 = vmatprep.subr.mxu0 %v827_v33 }
 0x35b   :  { %2399 = vmatpush3.msra.mxu1 %v656_v47  ;;  %2433 = vmatpush3.msra.mxu0 %v827_v33  ;;  %v820_v47 = vld [vmem:[#allocation2 + $0xf8] sm:$0xff] }
 0x35c   :  { %2400 = vmatprep.subr.mxu1 %v655_v48  ;;  %2434 = vmatprep.subr.mxu0 %v826_v35  ;;  %v965_v33 = vld [vmem:[#allocation2 + $0x198] sm:$0xff] }
 0x35d   :  { %2401 = vmatpush3.msra.mxu1 %v655_v48  ;;  %2435 = vmatpush3.msra.mxu0 %v826_v35  ;;  %v964_v35 = vld [vmem:[#allocation2 + $0x190] sm:$0xff] }
 0x35e   :  { %2402 = vmatprep.subr.mxu1 %v654_v49  ;;  %2436 = vmatprep.subr.mxu0 %v825_v36 }
 0x35f   :  { %2403 = vmatpush3.msra.mxu1 %v654_v49  ;;  %2437 = vmatpush3.msra.mxu0 %v825_v36  ;;  %v963_v36 = vld [vmem:[#allocation2 + $0x188] sm:$0xff] }
 0x360   :  { %2404 = vmatprep.subr.mxu1 %v653_v55  ;;  %2438 = vmatprep.subr.mxu0 %v824_v43 }
 0x361   :  { %2405 = vmatpush3.msra.mxu1 %v653_v55  ;;  %2439 = vmatpush3.msra.mxu0 %v824_v43  ;;  %v962_v43 = vld [vmem:[#allocation2 + $0x180] sm:$0xff] }
 0x362   :  { %2406 = vmatprep.subr.mxu1 %v652_v57  ;;  %2440 = vmatprep.subr.mxu0 %v823_v37 }
 0x363   :  { %2407 = vmatpush3.msra.mxu1 %v652_v57  ;;  %2441 = vmatpush3.msra.mxu0 %v823_v37  ;;  %v961_v37 = vld [vmem:[#allocation2 + $0x178] sm:$0xff] }
 0x364   :  { %2408 = vmatprep.subr.mxu1 %v651_v60  ;;  %2442 = vmatprep.subr.mxu0 %v822_v38 }
 0x365   :  { %2409 = vmatpush3.msra.mxu1 %v651_v60  ;;  %2443 = vmatpush3.msra.mxu0 %v822_v38  ;;  %v960_v38 = vld [vmem:[#allocation2 + $0x170] sm:$0xff] }
 0x366   :  { %2410 = vmatprep.subr.mxu1 %v650_v0  ;;  %2444 = vmatprep.subr.mxu0 %v821_v39 }
 0x367   :  { %2411 = vmatpush3.msra.mxu1 %v650_v0  ;;  %2445 = vmatpush3.msra.mxu0 %v821_v39  ;;  %v959_v39 = vld [vmem:[#allocation2 + $0x168] sm:$0xff] }
 0x368   :  { %2412 = vmatprep.subr.mxu1 %v649_v32  ;;  %2446 = vmatprep.subr.mxu0 %v820_v47 }
 0x369   :  { %2413 = vmatpush3.msra.mxu1 %v649_v32  ;;  %2447 = vmatpush3.msra.mxu0 %v820_v47  ;;  %v2125_v47 = vld [vmem:[#allocation2 + $0x160] ss:$0 sm:$0xff] }
 0x36a   :  { %2414 = vmatprep.subr.mxu1 %v648_v42  ;;  %2448 = vmatprep.subr.mxu0 %v819_v40 }
 0x36b   :  { %2415 = vmatpush3.msra.mxu1 %v648_v42  ;;  %2449 = vmatpush3.msra.mxu0 %v819_v40 }
 0x36c   :  { %2417 = vmatmul.mubr.f32.vlgmr.msra.gmra.mxu1 %v665_v3  ;;  %2450 = vmatprep.subr.mxu0 %v818_v41 }
 0x36d   :  { %2419 = vmatprep.mubr.f32.mxu1 %v666_v4  ;;  %2451 = vmatpush3.msra.mxu0 %v818_v41 }
 0x36e   :  { %2452 = vmatprep.subr.mxu0 %v817_v34 }
 0x36f   :  { %2453 = vmatpush3.msra.mxu0 %v817_v34 }
 0x370   :  { %2420 = vmatmul.mubr.f32.gmra.mxu1 %v667_v52 }
 0x42c   :  { %v2418_v6 = vpop.f32.mrf.mxu1 }
 0x42d   :  { %v754_v10 = vadd.f32 %v2418_v6, %v2903_v11  ;;  %v760_v11 = vld [vmem:[#allocation2 + $0xd8] sm:$0xff] }
 0x42e   :  { %v734_v12 = vpop.f32.mrf.mxu1 }
 0x42f   :  { %v3113_v15 = vadd.f32 %v758_v5, %v754_v10  ;;  %v753_v16 = vadd.f32 %v734_v12, %v2913_v18 }
 0x430   :  { %v2421_v19 = vpop.f32.mrf.mxu1 }
 0x431   :  { %v3116_v21 = vadd.f32 %v757_v13, %v753_v16  ;;  %767 = vadd.xlane.f32.xlu1 %v3113_v15  ;;  %v756_v30 = vadd.f32 %v2421_v19, %v2906_v14  ;;  %v774_v23 = vmul.f32 %v3113_v15, %v3113_v15 }
 0x432   :  { %v744_v22 = vpop.f32.mrf.mxu1 }
 0x433   :  { %765 = vadd.xlane.f32.xlu0 %v3116_v21  ;;  %v755_v24 = vadd.f32 %v744_v22, %v2911_v17  ;;  %v773_v18 = vmul.f32 %v3116_v21, %v3116_v21  ;;  %v3126_v25 = vadd.f32 %v760_v11, %v756_v30  ;;  %v974_v11 = vld [vmem:[#allocation2 + $0x1e0] sm:$0xff] }
 0x434   :  { %2460 = vmatprep.subr.mxu1 %v974_v11 }
 0x435   :  { %779 = vadd.xlane.f32.xlu1 %v774_v23  ;;  %v3128_v26 = vadd.f32 %v759_v53, %v755_v24  ;;  %v776_v14 = vmul.f32 %v3126_v25, %v3126_v25  ;;  %v973_v24 = vld [vmem:[#allocation2 + $0x1d8] sm:$0xff]  ;;  %2461 = vmatpush3.msra.mxu1 %v974_v11  ;;  %v971_v53 = vld [vmem:[#allocation2 + $0x1c8] sm:$0xff] }
 0x436   :  { %2462 = vmatprep.subr.mxu1 %v973_v24 }
 0x437   :  { %777 = vadd.xlane.f32.xlu0 %v773_v18  ;;  %v775_v17 = vmul.f32 %v3128_v26, %v3128_v26  ;;  %v972_v18 = vld [vmem:[#allocation2 + $0x1d0] sm:$0xff]  ;;  %2463 = vmatpush3.msra.mxu1 %v973_v24 }
 0x438   :  { %2464 = vmatprep.subr.mxu1 %v972_v18 }
 0x439   :  { %771 = vadd.xlane.f32.xlu1 %v3126_v25  ;;  %2465 = vmatpush3.msra.mxu1 %v972_v18  ;;  %v2126_v18 = vld [vmem:[#allocation2 + $0x1e8] ss:$0 sm:$0xff] }
 0x43a   :  { %2466 = vmatprep.subr.mxu1 %v971_v53 }
 0x43b   :  { %769 = vadd.xlane.f32.xlu0 %v3128_v26  ;;  %2467 = vmatpush3.msra.mxu1 %v971_v53 }
 0x43d   :  { %783 = vadd.xlane.f32.xlu1 %v776_v14  ;;  %v970_v14 = vld [vmem:[#allocation2 + $0x1c0] sm:$0xff] }
 0x43e   :  { %2468 = vmatprep.subr.mxu1 %v970_v14 }
 0x43f   :  { %781 = vadd.xlane.f32.xlu0 %v775_v17  ;;  %v969_v17 = vld [vmem:[#allocation2 + $0x1b8] sm:$0xff]  ;;  %2469 = vmatpush3.msra.mxu1 %v970_v14 }
 0x440   :  { %2470 = vmatprep.subr.mxu1 %v969_v17 }
 0x441   :  { %2471 = vmatpush3.msra.mxu1 %v969_v17 }
 0x442   :  { %2472 = vmatprep.subr.mxu1 %v968_v27 }
 0x443   :  { %2473 = vmatpush3.msra.mxu1 %v968_v27 }
 0x444   :  { %2474 = vmatprep.subr.mxu1 %v967_v61 }
 0x445   :  { %2475 = vmatpush3.msra.mxu1 %v967_v61 }
 0x446   :  { %2476 = vmatprep.subr.mxu1 %v966_v28 }
 0x447   :  { %2477 = vmatpush3.msra.mxu1 %v966_v28 }
 0x448   :  { %2478 = vmatprep.subr.mxu1 %v965_v33 }
 0x449   :  { %2479 = vmatpush3.msra.mxu1 %v965_v33 }
 0x44a   :  { %2480 = vmatprep.subr.mxu1 %v964_v35 }
 0x44b   :  { %2481 = vmatpush3.msra.mxu1 %v964_v35 }
 0x44c   :  { %2482 = vmatprep.subr.mxu1 %v963_v36 }
 0x44d   :  { %2483 = vmatpush3.msra.mxu1 %v963_v36 }
 0x44e   :  { %2484 = vmatprep.subr.mxu1 %v962_v43 }
 0x44f   :  { %2485 = vmatpush3.msra.mxu1 %v962_v43 }
 0x450   :  { %2486 = vmatprep.subr.mxu1 %v961_v37 }
 0x451   :  { %2487 = vmatpush3.msra.mxu1 %v961_v37 }
 0x452   :  { %2488 = vmatprep.subr.mxu1 %v960_v38 }
 0x453   :  { %2489 = vmatpush3.msra.mxu1 %v960_v38  ;;  %v1143_v38 = vld [vmem:[%s3417_s2 + $0x80] sm:$0xff] }
 0x454   :  { %2490 = vmatprep.subr.mxu1 %v959_v39 }
 0x455   :  { %2491 = vmatpush3.msra.mxu1 %v959_v39 }
 0x4ba   :  { %v768_v48 = vpop.xlane.xlu1 %767 }
 0x4bb   :  { %v786_v44 = vmul.f32 0.0078125, %v768_v48 }
 0x4bc   :  { %v766_v45 = vpop.xlane.xlu0 %765 }
 0x4bd   :  { %v785_v46 = vmul.f32 0.0078125, %v766_v45  ;;  %v794_v54 = vmul.f32 %v786_v44, %v786_v44  ;;  %v810_v5 = vsub.f32 %v3113_v15, %v786_v44 }
 0x4be   :  { %v780_v49 = vpop.xlane.xlu1 %779 }
 0x4bf   :  { %v790_v50 = vmul.f32 0.0078125, %v780_v49  ;;  %v793_v55 = vmul.f32 %v785_v46, %v785_v46  ;;  %v809_v7 = vsub.f32 %v3116_v21, %v785_v46 }
 0x4c0   :  { %v778_v51 = vpop.xlane.xlu0 %777 }
 0x4c1   :  { %v798_v62 = vsub.f32 %v790_v50, %v794_v54  ;;  %v789_v31 = vmul.f32 0.0078125, %v778_v51 }
 0x4c2   :  { %v772_v56 = vpop.xlane.xlu1 %771 }
 0x4c3   :  { %v802_v57 = vadd.f32 1e-05, %v798_v62  ;;  %v797_v8 = vsub.f32 %v789_v31, %v793_v55  ;;  %v788_v58 = vmul.f32 0.0078125, %v772_v56 }
 0x4c4   :  { %v770_v59 = vpop.xlane.xlu0 %769 }
 0x4c5   :  { %v801_v60 = vadd.f32 1e-05, %v797_v8  ;;  %2726 = vrsqrt.f32 %v802_v57  ;;  %v787_v20 = vmul.f32 0.0078125, %v770_v59  ;;  %v796_v0 = vmul.f32 %v788_v58, %v788_v58 }
 0x4c6   :  { %v784_v63 = vpop.xlane.xlu1 %783  ;;  %v812_v22 = vsub.f32 %v3126_v25, %v788_v58 }
 0x4c7   :  { %2728 = vrsqrt.f32 %v801_v60  ;;  %v792_v29 = vmul.f32 0.0078125, %v784_v63  ;;  %v795_v32 = vmul.f32 %v787_v20, %v787_v20  ;;  %v811_v16 = vsub.f32 %v3128_v26, %v787_v20 }
 0x4c8   :  { %v782_v1 = vpop.xlane.xlu0 %781 }
 0x4c9   :  { %v800_v2 = vsub.f32 %v792_v29, %v796_v0  ;;  %v791_v42 = vmul.f32 0.0078125, %v782_v1 }
 0x4cb   :  { %v804_v3 = vadd.f32 1e-05, %v800_v2  ;;  %v799_v4 = vsub.f32 %v791_v42, %v795_v32 }
 0x4cd   :  { %v803_v52 = vadd.f32 1e-05, %v799_v4  ;;  %2730 = vrsqrt.f32 %v804_v3 }
 0x4cf   :  { %2732 = vrsqrt.f32 %v803_v52 }
 0x4d2   :  { %v2727_v9 = vpop.eup %2726 }
 0x4d3   :  { %v814_v12 = vmul.f32 %v2727_v9, %v810_v5 }
 0x4d4   :  { %v2729_v6 = vpop.eup %2728 }
 0x4d5   :  { %v813_v10 = vmul.f32 %v2729_v6, %v809_v7 }
 0x4d7   :  { %2454 = vmatprep.mubr.f32.mxu0 %v813_v10 }
 0x4d8   :  { %2455 = vmatmul.mubr.f32.vlgmr.msra.gmra.mxu0 %v814_v12 }
 0x4da   :  { %v2731_v13 = vpop.eup %2730 }
 0x4db   :  { %v816_v23 = vmul.f32 %v2731_v13, %v812_v22 }
 0x4dc   :  { %v2733_v19 = vpop.eup %2732 }
 0x4dd   :  { %v815_v30 = vmul.f32 %v2733_v19, %v811_v16 }
 0x4df   :  { %2457 = vmatprep.mubr.f32.mxu0 %v815_v30 }
 0x4e0   :  { %2458 = vmatmul.mubr.f32.gmra.mxu0 %v816_v23 }
 0x4e1   :  { %2506 = vmatprep.mubr.msk.f32.mxu0 %vm326_vm2, %v1143_v38  ;;  %v1153_v38 = vld [vmem:[%s3417_s2 + $0xd0] sm:$0xff] }
 0x598   :  { %v2456_v40 = vpop.f32.mrf.mxu0 }
 0x599   :  { %v910_v41 = vadd.f32 %v2456_v40, %v2125_v47 }
 0x59a   :  { %v904_v34 = vpop.f32.mrf.mxu0 }
 0x59b   :  { %v928_v48 = vmul.f32 0.044715, %v910_v41  ;;  %v905_v44 = vadd.f32 %v2125_v47, %v904_v34  ;;  %v924_v6 = vmul.f32 0.5, %v910_v41 }
 0x59d   :  { %v932_v45 = vmul.f32 %v928_v48, %v910_v41  ;;  %v927_v46 = vmul.f32 0.044715, %v905_v44  ;;  %v923_v9 = vmul.f32 0.5, %v905_v44 }
 0x59f   :  { %v936_v49 = vmul.f32 %v932_v45, %v910_v41  ;;  %v931_v54 = vmul.f32 %v927_v46, %v905_v44 }
 0x5a0   :  { %v2459_v50 = vpop.f32.mrf.mxu0 }
 0x5a1   :  { %v940_v51 = vadd.f32 %v936_v49, %v910_v41  ;;  %v920_v55 = vadd.f32 %v2459_v50, %v2125_v47  ;;  %v935_v62 = vmul.f32 %v931_v54, %v905_v44 }
 0x5a2   :  { %v914_v31 = vpop.f32.mrf.mxu0 }
 0x5a3   :  { %v944_v56 = vmul.f32 0.7978846, %v940_v51  ;;  %v930_v57 = vmul.f32 0.044715, %v920_v55  ;;  %v915_v8 = vadd.f32 %v2125_v47, %v914_v31  ;;  %v939_v58 = vadd.f32 %v935_v62, %v905_v44 }
 0x5a4   :  { %v926_v30 = vmul.f32 0.5, %v920_v55 }
 0x5a5   :  { %2734 = vtanh.f32 %v944_v56  ;;  %v934_v59 = vmul.f32 %v930_v57, %v920_v55  ;;  %v929_v60 = vmul.f32 0.044715, %v915_v8  ;;  %v943_v20 = vmul.f32 0.7978846, %v939_v58 }
 0x5a6   :  { %v925_v19 = vmul.f32 0.5, %v915_v8 }
 0x5a7   :  { %v933_v63 = vmul.f32 %v929_v60, %v915_v8  ;;  %2736 = vtanh.f32 %v943_v20  ;;  %v938_v0 = vmul.f32 %v934_v59, %v920_v55 }
 0x5a9   :  { %v937_v29 = vmul.f32 %v933_v63, %v915_v8  ;;  %v942_v1 = vadd.f32 %v938_v0, %v920_v55 }
 0x5ab   :  { %v941_v32 = vadd.f32 %v937_v29, %v915_v8  ;;  %v946_v2 = vmul.f32 0.7978846, %v942_v1 }
 0x5ad   :  { %v945_v42 = vmul.f32 0.7978846, %v941_v32  ;;  %2738 = vtanh.f32 %v946_v2 }
 0x5af   :  { %2740 = vtanh.f32 %v945_v42 }
 0x5b2   :  { %v2735_v3 = vpop.eup %2734 }
 0x5b3   :  { %v952_v52 = vadd.f32 1.0, %v2735_v3  ;;  %v2127_v3 = vld [vmem:[#allocation2 + $0x1f0] ss:$0 sm:$0xff] }
 0x5b4   :  { %v2737_v4 = vpop.eup %2736 }
 0x5b5   :  { %v951_v7 = vadd.f32 1.0, %v2737_v4  ;;  %v956_v10 = vmul.f32 %v952_v52, %v924_v6  ;;  %v2128_v52 = vld [vmem:[#allocation2 + $0x1f8] ss:$0 sm:$0xff] }
 0x5b7   :  { %v955_v5 = vmul.f32 %v951_v7, %v923_v9 }
 0x5b9   :  { %2492 = vmatprep.mubr.f32.mxu1 %v955_v5 }
 0x5ba   :  { %v2739_v12 = vpop.eup %2738  ;;  %2493 = vmatmul.mubr.f32.vlgmr.msra.gmra.mxu1 %v956_v10 }
 0x5bb   :  { %v954_v16 = vadd.f32 1.0, %v2739_v12 }
 0x5bc   :  { %v2741_v13 = vpop.eup %2740 }
 0x5bd   :  { %v953_v22 = vadd.f32 1.0, %v2741_v13  ;;  %v958_v11 = vmul.f32 %v954_v16, %v926_v30 }
 0x5bf   :  { %v957_v23 = vmul.f32 %v953_v22, %v925_v19 }
 0x5c1   :  { %2495 = vmatprep.mubr.f32.mxu1 %v957_v23 }
 0x5c2   :  { %2496 = vmatmul.mubr.f32.gmra.mxu1 %v958_v11 }
 0x67a   :  { %v2494_v24 = vpop.f32.mrf.mxu1 }
 0x67b   :  { %v1061_v53 = vadd.f32 %v2494_v24, %v3113_v15 }
 0x67c   :  { %v1041_v17 = vpop.f32.mrf.mxu1 }
 0x67d   :  { %v3141_v14 = vadd.f32 %v2126_v18, %v1061_v53  ;;  %v1060_v36 = vadd.f32 %v1041_v17, %v3116_v21 }
 0x67f   :  { %1075 = vadd.xlane.f32.xlu1 %v3141_v14  ;;  %v3155_v37 = vadd.f32 %v2126_v18, %v1060_v36  ;;  %v1148_v36 = vld [vmem:[%s3417_s2 + $0xa8] sm:$0xff] }
 0x681   :  { %v1081_v21 = vmul.f32 %v3155_v37, %v3155_v37 }
 0x682   :  { %v2497_v27 = vpop.f32.mrf.mxu1 }
 0x683   :  { %v1063_v61 = vadd.f32 %v2497_v27, %v3126_v25  ;;  %v1144_v27 = vld [vmem:[%s3417_s2 + $0x88] sm:$0xff] }
 0x684   :  { %v1051_v28 = vpop.f32.mrf.mxu1 }
 0x685   :  { %v3145_v33 = vadd.f32 %v2126_v18, %v1063_v61  ;;  %v1062_v35 = vadd.f32 %v1051_v28, %v3128_v26  ;;  %v1082_v26 = vmul.f32 %v3141_v14, %v3141_v14  ;;  %v1145_v61 = vld [vmem:[%s3417_s2 + $0x90] sm:$0xff]  ;;  %v1146_v28 = vld [vmem:[%s3417_s2 + $0x98] sm:$0xff] }
 0x687   :  { %v3149_v43 = vadd.f32 %v2126_v18, %v1062_v35  ;;  %1079 = vadd.xlane.f32.xlu0 %v3145_v33  ;;  %v1084_v15 = vmul.f32 %v3145_v33, %v3145_v33  ;;  %v1147_v35 = vld [vmem:[%s3417_s2 + $0xa0] sm:$0xff] }
 0x689   :  { %1077 = vadd.xlane.f32.xlu1 %v3149_v43  ;;  %v1083_v25 = vmul.f32 %v3149_v43, %v3149_v43 }
 0x68b   :  { %1091 = vadd.xlane.f32.xlu0 %v1084_v15  ;;  %v1149_v15 = vld [vmem:[%s3417_s2 + $0xb0] sm:$0xff] }
 0x68d   :  { %1073 = vadd.xlane.f32.xlu1 %v3155_v37 }
 0x68f   :  { %1089 = vadd.xlane.f32.xlu0 %v1083_v25  ;;  %v1150_v25 = vld [vmem:[%s3417_s2 + $0xb8] sm:$0xff] }
 0x691   :  { %1085 = vadd.xlane.f32.xlu1 %v1081_v21  ;;  %v1151_v21 = vld [vmem:[%s3417_s2 + $0xc0] sm:$0xff] }
 0x693   :  { %1087 = vadd.xlane.f32.xlu0 %v1082_v26  ;;  %v1152_v26 = vld [vmem:[%s3417_s2 + $0xc8] sm:$0xff] }
 0x708   :  { %v1076_v39 = vpop.xlane.xlu1 %1075 }
 0x709   :  { %v1094_v51 = vmul.f32 0.0078125, %v1076_v39  ;;  %v1154_v39 = vld [vmem:[%s3417_s2 + $0xd8] sm:$0xff] }
 0x70b   :  { %v1102_v60 = vmul.f32 %v1094_v51, %v1094_v51  ;;  %v1118_v16 = vsub.f32 %v3141_v14, %v1094_v51 }
 0x710   :  { %v1080_v47 = vpop.xlane.xlu0 %1079 }
 0x711   :  { %v1096_v40 = vmul.f32 0.0078125, %v1080_v47  ;;  %v1155_v47 = vld [vmem:[%s3417_s2 + $0xe0] sm:$0xff] }
 0x712   :  { %v1078_v41 = vpop.xlane.xlu1 %1077 }
 0x713   :  { %v1104_v48 = vmul.f32 %v1096_v40, %v1096_v40  ;;  %v1095_v44 = vmul.f32 0.0078125, %v1078_v41  ;;  %v1120_v2 = vsub.f32 %v3145_v33, %v1096_v40  ;;  %v1156_v40 = vld [vmem:[%s3417_s2 + $0xe8] sm:$0xff]  ;;  %v1157_v41 = vld [vmem:[%s3417_s2 + $0xf0] sm:$0xff] }
 0x714   :  { %v1092_v34 = vpop.xlane.xlu0 %1091 }
 0x715   :  { %v1100_v45 = vmul.f32 0.0078125, %v1092_v34  ;;  %v1103_v55 = vmul.f32 %v1095_v44, %v1095_v44  ;;  %v1119_v9 = vsub.f32 %v3149_v43, %v1095_v44  ;;  %v1158_v34 = vld [vmem:[%s3417_s2 + $0xf8] sm:$0xff]  ;;  %s2853_s2 = smov [#allocation5]  }
 0x716   :  { %v1074_v46 = vpop.xlane.xlu1 %1073  ;;  %s2088_s15 = sshll.u32 %s2853_s2, 4  ;;  %s2089_s15 = int_to_ptr.vmem [resolvable:$true] %s2088_s15 }
 0x717   :  { %v1108_v49 = vsub.f32 %v1100_v45, %v1104_v48  ;;  %v1093_v54 = vmul.f32 0.0078125, %v1074_v46  ;;  %v1512_v48 = vld [vmem:[#allocation2 + $0x280] sm:$0xff]  ;;  %s2826_s16 = scalar_lea.vmem %s2089_s15, 512  ;;  %p2831_p6 = scmp.lt.s32.totalorder %s2089_s15, %s2089_s15 }
 0x718   :  { %v1090_v50 = vpop.xlane.xlu0 %1089  ;;  %p2827_p5 = scmp.ne.s32.totalorder %s2089_s15, %s2826_s16  ;;  %p2832_p7 = scmp.lt.s32.totalorder %s2826_s16, %s2826_s16 }
 0x719   :  { %v1112_v62 = vadd.f32 1e-05, %v1108_v49  ;;  %v1099_v31 = vmul.f32 0.0078125, %v1090_v50  ;;  %v1101_v57 = vmul.f32 %v1093_v54, %v1093_v54  ;;  %v1117_v5 = vsub.f32 %v3155_v37, %v1093_v54 }
 0x71a   :  { %v1086_v56 = vpop.xlane.xlu1 %1085  ;;  %p2833_p8 = por %p2832_p7, %p2831_p6 }
 0x71b   :  { %2742 = vrsqrt.f32 %v1112_v62  ;;  %v1107_v8 = vsub.f32 %v1099_v31, %v1103_v55  ;;  %v1097_v58 = vmul.f32 0.0078125, %v1086_v56  ;;  %v1170_v56 = vld [vmem:[#allocation2 + $0x258] sm:$0xff] }
 0x71c   :  { %v1088_v59 = vpop.xlane.xlu0 %1087  ;;  %p2834_p9 = pnand %p2833_p8, %p2827_p5 }
 0x71d   :  { %v1111_v20 = vadd.f32 1e-05, %v1107_v8  ;;  %v1105_v63 = vsub.f32 %v1097_v58, %v1101_v57  ;;  %v1098_v0 = vmul.f32 0.0078125, %v1088_v59  ;;  %v1169_v8 = vld [vmem:[#allocation2 + $0x250] sm:$0xff]  ;;  %v1168_v58 = vld [vmem:[#allocation2 + $0x248] sm:$0xff] }
 0x71f   :  { %2744 = vrsqrt.f32 %v1111_v20  ;;  %v1109_v29 = vadd.f32 1e-05, %v1105_v63  ;;  %v1106_v1 = vsub.f32 %v1098_v0, %v1102_v60  ;;  %v1172_v20 = vld [vmem:[#allocation2 + $0x268] sm:$0xff]  ;;  %v1167_v63 = vld [vmem:[#allocation2 + $0x240] sm:$0xff] }
 0x721   :  { %2746 = vrsqrt.f32 %v1109_v29  ;;  %v1110_v32 = vadd.f32 1e-05, %v1106_v1 }
 0x723   :  { %2748 = vrsqrt.f32 %v1110_v32  ;;  %v1171_v32 = vld [vmem:[#allocation2 + $0x260] sm:$0xff] }
 0x728   :  { %v2743_v42 = vpop.eup %2742 }
 0x729   :  { %v1124_v4 = vmul.f32 %v2743_v42, %v1120_v2  ;;  %v1166_v2 = vld [vmem:[#allocation2 + $0x238] sm:$0xff] }
 0x72b   :  { %v1133_v7 = vmul.f32 %v2127_v3, %v1124_v4 }
 0x72c   :  { %v2745_v6 = vpop.eup %2744 }
 0x72d   :  { %v1142_v10 = vadd.f32 %v2128_v52, %v1133_v7  ;;  %v1123_v12 = vmul.f32 %v2745_v6, %v1119_v9  ;;  %v1174_v9 = vld [vmem:[#allocation2 + $0x278] sm:$0xff]  ;;  %v1160_v7 = vld [vmem:[#allocation2 + $0x208] sm:$0xff]  ;;  %v1165_v6 = vld [vmem:[#allocation2 + $0x230] sm:$0xff] }
 0x72e   :  { %v2747_v13 = vpop.eup %2746 }
 0x72f   :  { %2498 = vmatprep.subr.mxu0 %v1142_v10  ;;  %v1132_v19 = vmul.f32 %v2127_v3, %v1123_v12  ;;  %v1121_v22 = vmul.f32 %v2747_v13, %v1117_v5 }
 0x730   :  { %v2749_v30 = vpop.eup %2748  ;;  %2499 = vmatpush3.msra.mxu0 %v1142_v10 }
 0x731   :  { %v1141_v23 = vadd.f32 %v2128_v52, %v1132_v19  ;;  %v1122_v11 = vmul.f32 %v2749_v30, %v1118_v16  ;;  %v1130_v18 = vmul.f32 %v2127_v3, %v1121_v22  ;;  %v1173_v22 = vld [vmem:[#allocation2 + $0x270] sm:$0xff]  ;;  %v1164_v30 = vld [vmem:[#allocation2 + $0x228] sm:$0xff] }
 0x733   :  { %2500 = vmatprep.subr.mxu0 %v1141_v23  ;;  %v1131_v24 = vmul.f32 %v2127_v3, %v1122_v11  ;;  %v1139_v17 = vadd.f32 %v2128_v52, %v1130_v18 }
 0x734   :  { %2501 = vmatpush3.msra.mxu0 %v1141_v23 }
 0x735   :  { %v1140_v53 = vadd.f32 %v2128_v52, %v1131_v24 }
 0x737   :  { %2502 = vmatprep.subr.mxu0 %v1140_v53 }
 0x738   :  { %2503 = vmatpush3.msra.mxu0 %v1140_v53 }
 0x739   :  { %2504 = vmatprep.subr.mxu0 %v1139_v17 }
 0x73a   :  { %2505 = vmatpush3.msra.mxu0 %v1139_v17 }
 0x73b   :  { %2507 = vmatmul.mubr.msk.f32.vlgmr.msra.gmra.mxu0 %vm326_vm2, %v1144_v27 }
 0x73c   :  { %2509 = vmatprep.mubr.msk.f32.mxu0 %vm326_vm2, %v1145_v61 }
 0x73f   :  { %2510 = vmatmul.mubr.msk.f32.gmra.mxu0 %vm326_vm2, %v1146_v28  ;;  %v1163_v28 = vld [vmem:[#allocation2 + $0x220] sm:$0xff] }
 0x740   :  { %2512 = vmatprep.mubr.msk.f32.mxu0 %vm326_vm2, %v1147_v35 }
 0x743   :  { %2513 = vmatmul.mubr.msk.f32.gmra.mxu0 %vm326_vm2, %v1148_v36 }
 0x744   :  { %2515 = vmatprep.mubr.msk.f32.mxu0 %vm326_vm2, %v1149_v15 }
 0x747   :  { %2516 = vmatmul.mubr.msk.f32.gmra.mxu0 %vm326_vm2, %v1150_v25 }
 0x748   :  { %2518 = vmatprep.mubr.msk.f32.mxu0 %vm326_vm2, %v1151_v21 }
 0x74b   :  { %2519 = vmatmul.mubr.msk.f32.gmra.mxu0 %vm326_vm2, %v1152_v26 }
 0x74c   :  { %2521 = vmatprep.mubr.msk.f32.mxu0 %vm326_vm2, %v1153_v38 }
 0x74f   :  { %2522 = vmatmul.mubr.msk.f32.gmra.mxu0 %vm326_vm2, %v1154_v39 }
 0x750   :  { %2524 = vmatprep.mubr.msk.f32.mxu0 %vm326_vm2, %v1155_v47  ;;  %v1162_v47 = vld [vmem:[#allocation2 + $0x218] sm:$0xff] }
 0x753   :  { %2525 = vmatmul.mubr.msk.f32.gmra.mxu0 %vm326_vm2, %v1156_v40 }
 0x754   :  { %2527 = vmatprep.mubr.msk.f32.mxu0 %vm326_vm2, %v1157_v41 }
 0x757   :  { %2528 = vmatmul.mubr.msk.f32.gmra.mxu0 %vm326_vm2, %v1158_v34 }
 0x758   :  { %2562 = vmatprep.mubr.f32.mxu0 %v1512_v48 }
 0x7fb   :  { %v2508_v44 = vpop.f32.mrf.mxu0 }
 0x7fc   :  { %v3261_v53 = vadd.f32 %v2508_v44, %v1160_v7  ;;  %v1159_v7 = vld [vmem:[#allocation2 + $0x200] sm:$0xff] }
 0x7fd   :  { %v3232_v45 = vpop.f32.mrf.mxu0 }
 0x7ff   :  { %v3234_v46 = vpop.f32.mrf.mxu0 }
 0x801   :  { %v3236_v49 = vpop.f32.mrf.mxu0 }
 0x803   :  { %v2514_v54 = vpop.f32.mrf.mxu0 }
 0x804   :  { %v3271_v21 = vadd.f32 %v2514_v54, %v1164_v30 }
 0x805   :  { %v1309_v50 = vpop.f32.mrf.mxu0 }
 0x806   :  { %v3280_v44 = vadd.f32 %v1309_v50, %v1163_v28  ;;  %v1389_v50 = vmul.f32 0.044715, %v3271_v21 }
 0x807   :  { %v2517_v51 = vpop.f32.mrf.mxu0 }
 0x808   :  { %v3253_v13 = vadd.f32 %v2517_v51, %v1166_v2 }
 0x809   :  { %v1319_v55 = vpop.f32.mrf.mxu0 }
 0x80a   :  { %v3263_v17 = vadd.f32 %v1319_v55, %v1165_v6  ;;  %v1391_v26 = vmul.f32 0.044715, %v3253_v13 }
 0x80b   :  { %v2520_v62 = vpop.f32.mrf.mxu0 }
 0x80c   :  { %v3242_v29 = vadd.f32 %v2520_v62, %v1168_v58  ;;  %v1390_v54 = vmul.f32 0.044715, %v3263_v17  ;;  %v1161_v62 = vld [vmem:[#allocation2 + $0x210] sm:$0xff]  ;;  %v3290_v58 = vadd.f32 %v3234_v46, %v1162_v47 }
 0x80d   :  { %v1329_v31 = vpop.f32.mrf.mxu0 }
 0x80e   :  { %v3247_v4 = vadd.f32 %v1329_v31, %v1167_v63  ;;  %v1393_v16 = vmul.f32 0.044715, %v3242_v29  ;;  %v1406_v46 = vmul.f32 %v1390_v54, %v3263_v17 }
 0x80f   :  { %v2523_v57 = vpop.f32.mrf.mxu0 }
 0x810   :  { %v3238_v59 = vadd.f32 %v2523_v57, %v1170_v56  ;;  %v1392_v27 = vmul.f32 0.044715, %v3247_v4  ;;  %v1409_v38 = vmul.f32 %v1393_v16, %v3242_v29 }
 0x811   :  { %v1339_v60 = vpop.f32.mrf.mxu0 }
 0x812   :  { %v3240_v0 = vadd.f32 %v1339_v60, %v1169_v8  ;;  %v1395_v42 = vmul.f32 0.044715, %v3238_v59  ;;  %v1408_v51 = vmul.f32 %v1392_v27, %v3247_v4  ;;  %v1407_v60 = vmul.f32 %v1391_v26, %v3253_v13 }
 0x813   :  { %v2526_v1 = vpop.f32.mrf.mxu0  ;;  %v1425_v2 = vmul.f32 %v1409_v38, %v3242_v29 }
 0x814   :  { %v3245_v3 = vadd.f32 %v2526_v1, %v1172_v20  ;;  %v1394_v5 = vmul.f32 0.044715, %v3240_v0  ;;  %v1411_v23 = vmul.f32 %v1395_v42, %v3238_v59  ;;  %v3299_v42 = vadd.f32 %v3236_v49, %v1161_v62 }
 0x815   :  { %v1349_v52 = vpop.f32.mrf.mxu0  ;;  %v1424_v16 = vmul.f32 %v1408_v51, %v3247_v4  ;;  %v1423_v49 = vmul.f32 %v1407_v60, %v3253_v13 }
 0x816   :  { %v1397_v10 = vmul.f32 0.044715, %v3245_v3  ;;  %v3251_v12 = vadd.f32 %v1349_v52, %v1171_v32  ;;  %v1410_v35 = vmul.f32 %v1394_v5, %v3240_v0  ;;  %v1427_v48 = vmul.f32 %v1411_v23, %v3238_v59 }
 0x817   :  { %v2529_v19 = vpop.f32.mrf.mxu0  ;;  %v1388_v52 = vmul.f32 0.044715, %v3280_v44  ;;  %v1386_v27 = vmul.f32 0.044715, %v3299_v42 }
 0x818   :  { %v1413_v11 = vmul.f32 %v1397_v10, %v3245_v3  ;;  %v1396_v24 = vmul.f32 0.044715, %v3251_v12  ;;  %v3259_v18 = vadd.f32 %v2529_v19, %v1174_v9  ;;  %v1426_v8 = vmul.f32 %v1410_v35, %v3240_v0 }
 0x819   :  { %v1359_v61 = vpop.f32.mrf.mxu0  ;;  %v1443_v32 = vadd.f32 %v1427_v48, %v3238_v59  ;;  %v1387_v19 = vmul.f32 0.044715, %v3290_v58  ;;  %v1440_v35 = vadd.f32 %v1424_v16, %v3247_v4 }
 0x81a   :  { %v1412_v36 = vmul.f32 %v1396_v24, %v3251_v12  ;;  %v1399_v15 = vmul.f32 0.044715, %v3259_v18  ;;  %v3269_v25 = vadd.f32 %v1359_v61, %v1173_v22  ;;  %v1429_v39 = vmul.f32 %v1413_v11, %v3245_v3 }
 0x81b   :  { %v1442_v10 = vadd.f32 %v1426_v8, %v3240_v0  ;;  %v1405_v22 = vmul.f32 %v1389_v50, %v3271_v21  ;;  %v1459_v23 = vmul.f32 0.7978846, %v1443_v32  ;;  %v1441_v11 = vadd.f32 %v1425_v2, %v3242_v29 }
 0x81c   :  { %v1415_v40 = vmul.f32 %v1399_v15, %v3259_v18  ;;  %v1398_v41 = vmul.f32 0.044715, %v3269_v25  ;;  %v1428_v34 = vmul.f32 %v1412_v36, %v3251_v12  ;;  %v1445_v55 = vadd.f32 %v1429_v39, %v3245_v3 }
 0x81d   :  { %v3311_v24 = vadd.f32 %v3232_v45, %v1159_v7  ;;  %v1404_v61 = vmul.f32 %v1388_v52, %v3280_v44  ;;  %v1458_v28 = vmul.f32 0.7978846, %v1442_v10  ;;  %v1422_v36 = vmul.f32 %v1406_v46, %v3263_v17 }
 0x81e   :  { %v1414_v31 = vmul.f32 %v1398_v41, %v3269_v25  ;;  %v1431_v56 = vmul.f32 %v1415_v40, %v3259_v18  ;;  %v1444_v57 = vadd.f32 %v1428_v34, %v3251_v12  ;;  %v1461_v20 = vmul.f32 0.7978846, %v1445_v55 }
 0x81f   :  { %v1385_v15 = vmul.f32 0.044715, %v3261_v53  ;;  %v1403_v26 = vmul.f32 %v1387_v19, %v3290_v58  ;;  %v1421_v38 = vmul.f32 %v1405_v22, %v3271_v21  ;;  %v1457_v45 = vmul.f32 0.7978846, %v1441_v11 }
 0x820   :  { %v1447_v63 = vadd.f32 %v1431_v56, %v3259_v18  ;;  %v1430_v1 = vmul.f32 %v1414_v31, %v3269_v25  ;;  %v1460_v9 = vmul.f32 0.7978846, %v1444_v57  ;;  %2750 = vtanh.f32 %v1461_v20 }
 0x821   :  { %v1439_v39 = vadd.f32 %v1423_v49, %v3253_v13  ;;  %v1384_v47 = vmul.f32 0.044715, %v3311_v24  ;;  %v1402_v40 = vmul.f32 %v1386_v27, %v3299_v42  ;;  %v1456_v41 = vmul.f32 0.7978846, %v1440_v35 }
 0x822   :  { %v1463_v6 = vmul.f32 0.7978846, %v1447_v63  ;;  %v1446_v5 = vadd.f32 %v1430_v1, %v3269_v25  ;;  %v1438_v34 = vadd.f32 %v1422_v36, %v3263_v17  ;;  %v1420_v48 = vmul.f32 %v1404_v61, %v3280_v44 }
 0x823   :  { %v1401_v54 = vmul.f32 %v1385_v15, %v3261_v53  ;;  %v1437_v51 = vadd.f32 %v1421_v38, %v3271_v21  ;;  %v1419_v55 = vmul.f32 %v1403_v26, %v3290_v58  ;;  %v1455_v62 = vmul.f32 0.7978846, %v1439_v39 }
 0x824   :  { %2752 = vtanh.f32 %v1463_v6  ;;  %v1462_v30 = vmul.f32 0.7978846, %v1446_v5  ;;  %v1400_v31 = vmul.f32 %v1384_v47, %v3311_v24  ;;  %v1418_v56 = vmul.f32 %v1402_v40, %v3299_v42 }
 0x825   :  { %2754 = vtanh.f32 %v1460_v9  ;;  %v1454_v57 = vmul.f32 0.7978846, %v1438_v34  ;;  %v1436_v8 = vadd.f32 %v1420_v48, %v3280_v44  ;;  %v1453_v50 = vmul.f32 0.7978846, %v1437_v51 }
 0x826   :  { %2756 = vtanh.f32 %v1462_v30  ;;  %v1435_v60 = vadd.f32 %v1419_v55, %v3290_v58  ;;  %v1417_v20 = vmul.f32 %v1401_v54, %v3261_v53  ;;  %v1434_v32 = vadd.f32 %v1418_v56, %v3299_v42 }
 0x827   :  { %2758 = vtanh.f32 %v1459_v23  ;;  %v1416_v2 = vmul.f32 %v1400_v31, %v3311_v24  ;;  %v1383_v46 = vmul.f32 0.5, %v3259_v18  ;;  %v1452_v7 = vmul.f32 0.7978846, %v1436_v8 }
 0x828   :  { %2760 = vtanh.f32 %v1458_v28  ;;  %v1451_v5 = vmul.f32 0.7978846, %v1435_v60  ;;  %v1433_v10 = vadd.f32 %v1417_v20, %v3261_v53  ;;  %v1382_v19 = vmul.f32 0.5, %v3269_v25 }
 0x829   :  { %2762 = vtanh.f32 %v1457_v45  ;;  %v1450_v23 = vmul.f32 0.7978846, %v1434_v32  ;;  %v1432_v11 = vadd.f32 %v1416_v2, %v3311_v24  ;;  %v1381_v18 = vmul.f32 0.5, %v3245_v3 }
 0x82a   :  { %2764 = vtanh.f32 %v1456_v41  ;;  %v1449_v35 = vmul.f32 0.7978846, %v1433_v10  ;;  %v1380_v15 = vmul.f32 0.5, %v3251_v12  ;;  %v1379_v39 = vmul.f32 0.5, %v3238_v59 }
 0x82b   :  { %2766 = vtanh.f32 %v1455_v62  ;;  %v1448_v38 = vmul.f32 0.7978846, %v1432_v11  ;;  %v1378_v41 = vmul.f32 0.5, %v3240_v0  ;;  %v1377_v54 = vmul.f32 0.5, %v3242_v29  ;;  %v1514_v11 = vld [vmem:[#allocation2 + $0x290] sm:$0xff] }
 0x82c   :  { %2768 = vtanh.f32 %v1454_v57  ;;  %v1376_v31 = vmul.f32 0.5, %v3247_v4  ;;  %v1375_v57 = vmul.f32 0.5, %v3253_v13  ;;  %v1374_v60 = vmul.f32 0.5, %v3263_v17 }
 0x82d   :  { %v2751_v63 = vpop.eup %2750  ;;  %2770 = vtanh.f32 %v1453_v50  ;;  %v1373_v4 = vmul.f32 0.5, %v3271_v21  ;;  %v1372_v13 = vmul.f32 0.5, %v3280_v44  ;;  %v1371_v17 = vmul.f32 0.5, %v3290_v58 }
 0x82e   :  { %v1493_v49 = vadd.f32 1.0, %v2751_v63  ;;  %2772 = vtanh.f32 %v1452_v7  ;;  %v1370_v21 = vmul.f32 0.5, %v3299_v42  ;;  %v1369_v44 = vmul.f32 0.5, %v3261_v53  ;;  %v1515_v42 = vld [vmem:[#allocation2 + $0x298] sm:$0xff]  ;;  %v1679_v53 = vld [vmem:[#allocation2 + $0x330] sm:$0xff] }
 0x82f   :  { %2774 = vtanh.f32 %v1451_v5 }
 0x830   :  { %v1509_v36 = vmul.f32 %v1493_v49, %v1381_v18  ;;  %2776 = vtanh.f32 %v1450_v23  ;;  %v1513_v23 = vld [vmem:[#allocation2 + $0x288] sm:$0xff] }
 0x831   :  { %v2753_v1 = vpop.eup %2752  ;;  %2778 = vtanh.f32 %v1449_v35  ;;  %v1605_v35 = vld [vmem:[#allocation2 + $0x2a0] sm:$0xff] }
 0x832   :  { %v2755_v52 = vpop.eup %2754  ;;  %v1495_v9 = vadd.f32 1.0, %v2753_v1  ;;  %2780 = vtanh.f32 %v1448_v38 }
 0x833   :  { %v2757_v6 = vpop.eup %2756  ;;  %v1492_v61 = vadd.f32 1.0, %v2755_v52 }
 0x834   :  { %v1511_v16 = vmul.f32 %v1495_v9, %v1383_v46  ;;  %v1494_v22 = vadd.f32 1.0, %v2757_v6  ;;  %v2759_v30 = vpop.eup %2758 }
 0x835   :  { %v2761_v28 = vpop.eup %2760  ;;  %v1491_v25 = vadd.f32 1.0, %v2759_v30  ;;  %v1508_v45 = vmul.f32 %v1492_v61, %v1380_v15  ;;  %v1368_v30 = vmul.f32 0.5, %v3311_v24  ;;  %v1606_v24 = vld [vmem:[#allocation2 + $0x2a8] sm:$0xff] }
 0x836   :  { %2530 = vmatprep.subr.mxu0 %v1511_v16  ;;  %v1510_v27 = vmul.f32 %v1494_v22, %v1382_v19  ;;  %v2763_v26 = vpop.eup %2762  ;;  %v1490_v47 = vadd.f32 1.0, %v2761_v28 }
 0x837   :  { %2531 = vmatpush3.msra.mxu0 %v1511_v16  ;;  %v2765_v3 = vpop.eup %2764  ;;  %v1507_v40 = vmul.f32 %v1491_v25, %v1379_v39  ;;  %v1489_v34 = vadd.f32 1.0, %v2763_v26 }
 0x838   :  { %2532 = vmatprep.subr.mxu0 %v1510_v27  ;;  %v2767_v12 = vpop.eup %2766  ;;  %v1506_v48 = vmul.f32 %v1490_v47, %v1378_v41  ;;  %v1488_v51 = vadd.f32 1.0, %v2765_v3  ;;  %v1607_v3 = vld [vmem:[#allocation2 + $0x2b0] sm:$0xff] }
 0x839   :  { %2533 = vmatpush3.msra.mxu0 %v1510_v27  ;;  %v2769_v55 = vpop.eup %2768  ;;  %v1505_v62 = vmul.f32 %v1489_v34, %v1377_v54  ;;  %v1487_v56 = vadd.f32 1.0, %v2767_v12  ;;  %v1680_v27 = vld [vmem:[#allocation2 + $0x338] sm:$0xff]  ;;  %v1678_v34 = vld [vmem:[#allocation2 + $0x328] sm:$0xff]  ;;  %v1677_v12 = vld [vmem:[#allocation2 + $0x320] sm:$0xff] }
 0x83a   :  { %2534 = vmatprep.subr.mxu0 %v1509_v36  ;;  %v2771_v59 = vpop.eup %2770  ;;  %v1504_v0 = vmul.f32 %v1488_v51, %v1376_v31  ;;  %v1486_v8 = vadd.f32 1.0, %v2769_v55  ;;  %2568 = vmatprep.subr.mxu1 %v1680_v27  ;;  %v1675_v54 = vld [vmem:[#allocation2 + $0x310] sm:$0xff]  ;;  %v1674_v51 = vld [vmem:[#allocation2 + $0x308] sm:$0xff]  ;;  %v1673_v55 = vld [vmem:[#allocation2 + $0x300] sm:$0xff] }
 0x83b   :  { %2535 = vmatpush3.msra.mxu0 %v1509_v36  ;;  %v2773_v50 = vpop.eup %2772  ;;  %v1503_v29 = vmul.f32 %v1487_v56, %v1375_v57  ;;  %v1485_v20 = vadd.f32 1.0, %v2771_v59  ;;  %2569 = vmatpush3.msra.mxu1 %v1680_v27  ;;  %v1672_v59 = vld [vmem:[#allocation2 + $0x2f8] sm:$0xff]  ;;  %v1670_v31 = vld [vmem:[#allocation2 + $0x2e8] sm:$0xff]  ;;  %v1669_v56 = vld [vmem:[#allocation2 + $0x2e0] sm:$0xff] }
 0x83c   :  { %2536 = vmatprep.subr.mxu0 %v1508_v45  ;;  %v2775_v63 = vpop.eup %2774  ;;  %v1502_v1 = vmul.f32 %v1486_v8, %v1374_v60  ;;  %v1484_v32 = vadd.f32 1.0, %v2773_v50  ;;  %2570 = vmatprep.subr.mxu1 %v1679_v53  ;;  %v1667_v57 = vld [vmem:[#allocation2 + $0x2d0] sm:$0xff]  ;;  %v1666_v8 = vld [vmem:[#allocation2 + $0x2c8] sm:$0xff]  ;;  %v1665_v50 = vld [vmem:[#allocation2 + $0x2c0] sm:$0xff] }
 0x83d   :  { %2537 = vmatpush3.msra.mxu0 %v1508_v45  ;;  %v2777_v2 = vpop.eup %2776  ;;  %v1501_v52 = vmul.f32 %v1485_v20, %v1373_v4  ;;  %v1483_v46 = vadd.f32 1.0, %v2775_v63  ;;  %2571 = vmatpush3.msra.mxu1 %v1679_v53 }
 0x83e   :  { %2538 = vmatprep.subr.mxu0 %v1507_v40  ;;  %v2779_v9 = vpop.eup %2778  ;;  %v1500_v7 = vmul.f32 %v1484_v32, %v1372_v13  ;;  %v1482_v6 = vadd.f32 1.0, %v2777_v2  ;;  %2572 = vmatprep.subr.mxu1 %v1678_v34 }
 0x83f   :  { %2539 = vmatpush3.msra.mxu0 %v1507_v40  ;;  %v2781_v5 = vpop.eup %2780  ;;  %v1499_v10 = vmul.f32 %v1483_v46, %v1371_v17  ;;  %v1481_v16 = vadd.f32 1.0, %v2779_v9  ;;  %2573 = vmatpush3.msra.mxu1 %v1678_v34  ;;  %v1816_v34 = vld [vmem:[#allocation2 + $0x390] sm:$0xff] }
 0x840   :  { %2540 = vmatprep.subr.mxu0 %v1506_v48  ;;  %v1498_v19 = vmul.f32 %v1482_v6, %v1370_v21  ;;  %v1480_v22 = vadd.f32 1.0, %v2781_v5  ;;  %2574 = vmatprep.subr.mxu1 %v1677_v12 }
 0x841   :  { %2541 = vmatpush3.msra.mxu0 %v1506_v48  ;;  %v1497_v49 = vmul.f32 %v1481_v16, %v1369_v44  ;;  %2575 = vmatpush3.msra.mxu1 %v1677_v12  ;;  %v1676_v48 = vld [vmem:[#allocation2 + $0x318] sm:$0xff]  ;;  %v1815_v12 = vld [vmem:[#allocation2 + $0x388] sm:$0xff] }
 0x842   :  { %2542 = vmatprep.subr.mxu0 %v1505_v62  ;;  %v1496_v58 = vmul.f32 %v1480_v22, %v1368_v30  ;;  %2576 = vmatprep.subr.mxu1 %v1676_v48 }
 0x843   :  { %2543 = vmatpush3.msra.mxu0 %v1505_v62  ;;  %2577 = vmatpush3.msra.mxu1 %v1676_v48  ;;  %v1671_v62 = vld [vmem:[#allocation2 + $0x2f0] sm:$0xff]  ;;  %v1814_v48 = vld [vmem:[#allocation2 + $0x380] sm:$0xff] }
 0x844   :  { %2544 = vmatprep.subr.mxu0 %v1504_v0  ;;  %2578 = vmatprep.subr.mxu1 %v1675_v54 }
 0x845   :  { %2545 = vmatpush3.msra.mxu0 %v1504_v0  ;;  %2579 = vmatpush3.msra.mxu1 %v1675_v54  ;;  %v1668_v0 = vld [vmem:[#allocation2 + $0x2d8] sm:$0xff] }
 0x846   :  { %2546 = vmatprep.subr.mxu0 %v1503_v29  ;;  %2580 = vmatprep.subr.mxu1 %v1674_v51  ;;  %v1813_v54 = vld [vmem:[#allocation2 + $0x378] sm:$0xff] }
 0x847   :  { %2547 = vmatpush3.msra.mxu0 %v1503_v29  ;;  %2581 = vmatpush3.msra.mxu1 %v1674_v51  ;;  %v1812_v51 = vld [vmem:[#allocation2 + $0x370] sm:$0xff] }
 0x848   :  { %2548 = vmatprep.subr.mxu0 %v1502_v1  ;;  %2582 = vmatprep.subr.mxu1 %v1673_v55 }
 0x849   :  { %2549 = vmatpush3.msra.mxu0 %v1502_v1  ;;  %2583 = vmatpush3.msra.mxu1 %v1673_v55  ;;  %v1811_v55 = vld [vmem:[#allocation2 + $0x368] sm:$0xff] }
 0x84a   :  { %2550 = vmatprep.subr.mxu0 %v1501_v52  ;;  %2584 = vmatprep.subr.mxu1 %v1672_v59 }
 0x84b   :  { %2551 = vmatpush3.msra.mxu0 %v1501_v52  ;;  %2585 = vmatpush3.msra.mxu1 %v1672_v59  ;;  %v1810_v59 = vld [vmem:[#allocation2 + $0x360] sm:$0xff] }
 0x84c   :  { %2552 = vmatprep.subr.mxu0 %v1500_v7  ;;  %2586 = vmatprep.subr.mxu1 %v1671_v62 }
 0x84d   :  { %2553 = vmatpush3.msra.mxu0 %v1500_v7  ;;  %2587 = vmatpush3.msra.mxu1 %v1671_v62  ;;  %v1809_v62 = vld [vmem:[#allocation2 + $0x358] sm:$0xff] }
 0x84e   :  { %2554 = vmatprep.subr.mxu0 %v1499_v10  ;;  %2588 = vmatprep.subr.mxu1 %v1670_v31 }
 0x84f   :  { %2555 = vmatpush3.msra.mxu0 %v1499_v10  ;;  %2589 = vmatpush3.msra.mxu1 %v1670_v31  ;;  %v1808_v31 = vld [vmem:[#allocation2 + $0x350] sm:$0xff] }
 0x850   :  { %2556 = vmatprep.subr.mxu0 %v1498_v19  ;;  %2590 = vmatprep.subr.mxu1 %v1669_v56 }
 0x851   :  { %2557 = vmatpush3.msra.mxu0 %v1498_v19  ;;  %2591 = vmatpush3.msra.mxu1 %v1669_v56  ;;  %v1807_v56 = vld [vmem:[#allocation2 + $0x348] sm:$0xff] }
 0x852   :  { %2558 = vmatprep.subr.mxu0 %v1497_v49  ;;  %2592 = vmatprep.subr.mxu1 %v1668_v0 }
 0x853   :  { %2559 = vmatpush3.msra.mxu0 %v1497_v49  ;;  %2593 = vmatpush3.msra.mxu1 %v1668_v0  ;;  %v2145_v0 = vld [vmem:[#allocation2 + $0x340] ss:$0 sm:$0xff] }
 0x854   :  { %2560 = vmatprep.subr.mxu0 %v1496_v58  ;;  %2594 = vmatprep.subr.mxu1 %v1667_v57 }
 0x855   :  { %2561 = vmatpush3.msra.mxu0 %v1496_v58  ;;  %2595 = vmatpush3.msra.mxu1 %v1667_v57 }
 0x856   :  { %2563 = vmatmul.mubr.f32.vlgmr.msra.gmra.mxu0 %v1513_v23  ;;  %2596 = vmatprep.subr.mxu1 %v1666_v8 }
 0x857   :  { %2565 = vmatprep.mubr.f32.mxu0 %v1514_v11  ;;  %2597 = vmatpush3.msra.mxu1 %v1666_v8 }
 0x858   :  { %2598 = vmatprep.subr.mxu1 %v1665_v50 }
 0x859   :  { %2599 = vmatpush3.msra.mxu1 %v1665_v50 }
 0x85a   :  { %2566 = vmatmul.mubr.f32.gmra.mxu0 %v1515_v42 }
 0x916   :  { %v2564_v18 = vpop.f32.mrf.mxu0 }
 0x917   :  { %v1602_v61 = vadd.f32 %v2564_v18, %v3141_v14  ;;  %v1608_v14 = vld [vmem:[#allocation2 + $0x2b8] sm:$0xff] }
 0x918   :  { %v1582_v28 = vpop.f32.mrf.mxu0 }
 0x919   :  { %v3354_v36 = vadd.f32 %v1606_v24, %v1602_v61  ;;  %v1601_v15 = vadd.f32 %v1582_v28, %v3155_v37 }
 0x91a   :  { %v2567_v25 = vpop.f32.mrf.mxu0 }
 0x91b   :  { %v3357_v26 = vadd.f32 %v1605_v35, %v1601_v15  ;;  %1615 = vadd.xlane.f32.xlu1 %v3354_v36  ;;  %v1604_v45 = vadd.f32 %v2567_v25, %v3145_v33  ;;  %v1622_v39 = vmul.f32 %v3354_v36, %v3354_v36 }
 0x91c   :  { %v1592_v38 = vpop.f32.mrf.mxu0 }
 0x91d   :  { %1613 = vadd.xlane.f32.xlu0 %v3357_v26  ;;  %v1603_v47 = vadd.f32 %v1592_v38, %v3149_v43  ;;  %v1621_v37 = vmul.f32 %v3357_v26, %v3357_v26  ;;  %v3367_v40 = vadd.f32 %v1608_v14, %v1604_v45  ;;  %v1822_v14 = vld [vmem:[#allocation2 + $0x3c0] sm:$0xff] }
 0x91e   :  { %2606 = vmatprep.subr.mxu0 %v1822_v14 }
 0x91f   :  { %1627 = vadd.xlane.f32.xlu1 %v1622_v39  ;;  %v3369_v41 = vadd.f32 %v1607_v3, %v1603_v47  ;;  %v1624_v33 = vmul.f32 %v3367_v40, %v3367_v40  ;;  %v1821_v47 = vld [vmem:[#allocation2 + $0x3b8] sm:$0xff]  ;;  %2607 = vmatpush3.msra.mxu0 %v1822_v14  ;;  %v1819_v3 = vld [vmem:[#allocation2 + $0x3a8] sm:$0xff] }
 0x920   :  { %2608 = vmatprep.subr.mxu0 %v1821_v47 }
 0x921   :  { %1625 = vadd.xlane.f32.xlu0 %v1621_v37  ;;  %v1623_v43 = vmul.f32 %v3369_v41, %v3369_v41  ;;  %v1820_v37 = vld [vmem:[#allocation2 + $0x3b0] sm:$0xff]  ;;  %2609 = vmatpush3.msra.mxu0 %v1821_v47  ;;  %v1988_v47 = vld [vmem:[#allocation2 + $0x448] sm:$0xff] }
 0x922   :  { %2610 = vmatprep.subr.mxu0 %v1820_v37  ;;  %2644 = vmatprep.subr.mxu1 %v1988_v47 }
 0x923   :  { %1619 = vadd.xlane.f32.xlu1 %v3367_v40  ;;  %2611 = vmatpush3.msra.mxu0 %v1820_v37  ;;  %v1987_v37 = vld [vmem:[#allocation2 + $0x440] sm:$0xff] }
 0x924   :  { %2612 = vmatprep.subr.mxu0 %v1819_v3 }
 0x925   :  { %1617 = vadd.xlane.f32.xlu0 %v3369_v41  ;;  %2613 = vmatpush3.msra.mxu0 %v1819_v3 }
 0x927   :  { %1631 = vadd.xlane.f32.xlu1 %v1624_v33  ;;  %v1818_v33 = vld [vmem:[#allocation2 + $0x3a0] sm:$0xff] }
 0x928   :  { %2614 = vmatprep.subr.mxu0 %v1818_v33 }
 0x929   :  { %1629 = vadd.xlane.f32.xlu0 %v1623_v43  ;;  %v1817_v43 = vld [vmem:[#allocation2 + $0x398] sm:$0xff]  ;;  %2615 = vmatpush3.msra.mxu0 %v1818_v33  ;;  %v2146_v33 = vld [vmem:[#allocation2 + $0x3c8] ss:$0 sm:$0xff] }
 0x92a   :  { %2616 = vmatprep.subr.mxu0 %v1817_v43 }
 0x92b   :  { %2617 = vmatpush3.msra.mxu0 %v1817_v43 }
 0x92c   :  { %2618 = vmatprep.subr.mxu0 %v1816_v34 }
 0x92d   :  { %2619 = vmatpush3.msra.mxu0 %v1816_v34 }
 0x92e   :  { %2620 = vmatprep.subr.mxu0 %v1815_v12 }
 0x92f   :  { %2621 = vmatpush3.msra.mxu0 %v1815_v12 }
 0x930   :  { %2622 = vmatprep.subr.mxu0 %v1814_v48 }
 0x931   :  { %2623 = vmatpush3.msra.mxu0 %v1814_v48 }
 0x932   :  { %2624 = vmatprep.subr.mxu0 %v1813_v54 }
 0x933   :  { %2625 = vmatpush3.msra.mxu0 %v1813_v54 }
 0x934   :  { %2626 = vmatprep.subr.mxu0 %v1812_v51 }
 0x935   :  { %2627 = vmatpush3.msra.mxu0 %v1812_v51 }
 0x936   :  { %2628 = vmatprep.subr.mxu0 %v1811_v55 }
 0x937   :  { %2629 = vmatpush3.msra.mxu0 %v1811_v55 }
 0x938   :  { %2630 = vmatprep.subr.mxu0 %v1810_v59 }
 0x939   :  { %2631 = vmatpush3.msra.mxu0 %v1810_v59 }
 0x93a   :  { %2632 = vmatprep.subr.mxu0 %v1809_v62 }
 0x93b   :  { %2633 = vmatpush3.msra.mxu0 %v1809_v62 }
 0x93c   :  { %2634 = vmatprep.subr.mxu0 %v1808_v31 }
 0x93d   :  { %2635 = vmatpush3.msra.mxu0 %v1808_v31 }
 0x93e   :  { %2636 = vmatprep.subr.mxu0 %v1807_v56 }
 0x93f   :  { %2637 = vmatpush3.msra.mxu0 %v1807_v56 }
 0x9a4   :  { %v1616_v29 = vpop.xlane.xlu1 %1615 }
 0x9a5   :  { %v1634_v60 = vmul.f32 0.0078125, %v1616_v29 }
 0x9a6   :  { %v1614_v20 = vpop.xlane.xlu0 %1613 }
 0x9a7   :  { %v1633_v63 = vmul.f32 0.0078125, %v1614_v20  ;;  %v1642_v4 = vmul.f32 %v1634_v60, %v1634_v60  ;;  %v1658_v24 = vsub.f32 %v3354_v36, %v1634_v60 }
 0x9a8   :  { %v1628_v1 = vpop.xlane.xlu1 %1627 }
 0x9a9   :  { %v1638_v32 = vmul.f32 0.0078125, %v1628_v1  ;;  %v1641_v52 = vmul.f32 %v1633_v63, %v1633_v63  ;;  %v1657_v53 = vsub.f32 %v3357_v26, %v1633_v63 }
 0x9aa   :  { %v1626_v2 = vpop.xlane.xlu0 %1625 }
 0x9ab   :  { %v1646_v13 = vsub.f32 %v1638_v32, %v1642_v4  ;;  %v1637_v46 = vmul.f32 0.0078125, %v1626_v2 }
 0x9ac   :  { %v1620_v9 = vpop.xlane.xlu1 %1619 }
 0x9ad   :  { %v1650_v7 = vadd.f32 1e-05, %v1646_v13  ;;  %v1645_v17 = vsub.f32 %v1637_v46, %v1641_v52  ;;  %v1636_v6 = vmul.f32 0.0078125, %v1620_v9 }
 0x9ae   :  { %v1618_v5 = vpop.xlane.xlu0 %1617 }
 0x9af   :  { %v1649_v10 = vadd.f32 1e-05, %v1645_v17  ;;  %2782 = vrsqrt.f32 %v1650_v7  ;;  %v1635_v21 = vmul.f32 0.0078125, %v1618_v5  ;;  %v1644_v19 = vmul.f32 %v1636_v6, %v1636_v6 }
 0x9b0   :  { %v1632_v16 = vpop.xlane.xlu1 %1631  ;;  %v1660_v38 = vsub.f32 %v3367_v40, %v1636_v6 }
 0x9b1   :  { %2784 = vrsqrt.f32 %v1649_v10  ;;  %v1640_v44 = vmul.f32 0.0078125, %v1632_v16  ;;  %v1643_v49 = vmul.f32 %v1635_v21, %v1635_v21  ;;  %v1659_v15 = vsub.f32 %v3369_v41, %v1635_v21 }
 0x9b2   :  { %v1630_v22 = vpop.xlane.xlu0 %1629 }
 0x9b3   :  { %v1648_v30 = vsub.f32 %v1640_v44, %v1644_v19  ;;  %v1639_v58 = vmul.f32 0.0078125, %v1630_v22 }
 0x9b5   :  { %v1652_v23 = vadd.f32 1e-05, %v1648_v30  ;;  %v1647_v11 = vsub.f32 %v1639_v58, %v1643_v49 }
 0x9b7   :  { %v1651_v42 = vadd.f32 1e-05, %v1647_v11  ;;  %2786 = vrsqrt.f32 %v1652_v23 }
 0x9b9   :  { %2788 = vrsqrt.f32 %v1651_v42 }
 0x9bc   :  { %v2783_v27 = vpop.eup %2782 }
 0x9bd   :  { %v1662_v28 = vmul.f32 %v2783_v27, %v1658_v24 }
 0x9be   :  { %v2785_v18 = vpop.eup %2784 }
 0x9bf   :  { %v1661_v61 = vmul.f32 %v2785_v18, %v1657_v53 }
 0x9c1   :  { %2600 = vmatprep.mubr.f32.mxu1 %v1661_v61 }
 0x9c2   :  { %2601 = vmatmul.mubr.f32.vlgmr.msra.gmra.mxu1 %v1662_v28 }
 0x9c3   :  { %2645 = vmatpush3.msra.mxu1 %v1988_v47 }
 0x9c4   :  { %v2787_v35 = vpop.eup %2786  ;;  %2646 = vmatprep.subr.mxu1 %v1987_v37 }
 0x9c5   :  { %v1664_v39 = vmul.f32 %v2787_v35, %v1660_v38  ;;  %2647 = vmatpush3.msra.mxu1 %v1987_v37 }
 0x9c6   :  { %v2789_v25 = vpop.eup %2788 }
 0x9c7   :  { %v1663_v45 = vmul.f32 %v2789_v25, %v1659_v15 }
 0x9c9   :  { %2603 = vmatprep.mubr.f32.mxu1 %v1663_v45 }
 0x9ca   :  { %2604 = vmatmul.mubr.f32.gmra.mxu1 %v1664_v39 }
 0xa82   :  { %v2602_v57 = vpop.f32.mrf.mxu1 }
 0xa83   :  { %v1758_v8 = vadd.f32 %v2602_v57, %v2145_v0  ;;  %v1986_v57 = vld [vmem:[#allocation2 + $0x438] sm:$0xff] }
 0xa84   :  { %v1752_v50 = vpop.f32.mrf.mxu1  ;;  %2648 = vmatprep.subr.mxu1 %v1986_v57 }
 0xa85   :  { %v1776_v29 = vmul.f32 0.044715, %v1758_v8  ;;  %v1753_v60 = vadd.f32 %v2145_v0, %v1752_v50  ;;  %v1772_v18 = vmul.f32 0.5, %v1758_v8  ;;  %2649 = vmatpush3.msra.mxu1 %v1986_v57  ;;  %v1983_v50 = vld [vmem:[#allocation2 + $0x420] sm:$0xff] }
 0xa87   :  { %v1780_v20 = vmul.f32 %v1776_v29, %v1758_v8  ;;  %v1775_v63 = vmul.f32 0.044715, %v1753_v60  ;;  %v1771_v27 = vmul.f32 0.5, %v1753_v60  ;;  %v1982_v29 = vld [vmem:[#allocation2 + $0x418] sm:$0xff] }
 0xa89   :  { %v1784_v1 = vmul.f32 %v1780_v20, %v1758_v8  ;;  %v1779_v4 = vmul.f32 %v1775_v63, %v1753_v60  ;;  %v1980_v20 = vld [vmem:[#allocation2 + $0x408] sm:$0xff]  ;;  %v1979_v63 = vld [vmem:[#allocation2 + $0x400] sm:$0xff] }
 0xa8a   :  { %v2605_v32 = vpop.f32.mrf.mxu1 }
 0xa8b   :  { %v1788_v2 = vadd.f32 %v1784_v1, %v1758_v8  ;;  %v1768_v52 = vadd.f32 %v2605_v32, %v2145_v0  ;;  %v1783_v13 = vmul.f32 %v1779_v4, %v1753_v60  ;;  %v1985_v8 = vld [vmem:[#allocation2 + $0x430] sm:$0xff]  ;;  %v1978_v1 = vld [vmem:[#allocation2 + $0x3f8] sm:$0xff]  ;;  %v1976_v32 = vld [vmem:[#allocation2 + $0x3e8] sm:$0xff] }
 0xa8c   :  { %v1762_v46 = vpop.f32.mrf.mxu1  ;;  %2650 = vmatprep.subr.mxu1 %v1985_v8  ;;  %v1977_v4 = vld [vmem:[#allocation2 + $0x3f0] sm:$0xff] }
 0xa8d   :  { %v1792_v9 = vmul.f32 0.7978846, %v1788_v2  ;;  %v1778_v7 = vmul.f32 0.044715, %v1768_v52  ;;  %v1763_v17 = vadd.f32 %v2145_v0, %v1762_v46  ;;  %v1787_v6 = vadd.f32 %v1783_v13, %v1753_v60  ;;  %2651 = vmatpush3.msra.mxu1 %v1985_v8  ;;  %v1981_v60 = vld [vmem:[#allocation2 + $0x410] sm:$0xff]  ;;  %v1975_v2 = vld [vmem:[#allocation2 + $0x3e0] sm:$0xff] }
 0xa8e   :  { %v1774_v45 = vmul.f32 0.5, %v1768_v52  ;;  %v1973_v13 = vld [vmem:[#allocation2 + $0x3d0] sm:$0xff] }
 0xa8f   :  { %2790 = vtanh.f32 %v1792_v9  ;;  %v1782_v5 = vmul.f32 %v1778_v7, %v1768_v52  ;;  %v1777_v10 = vmul.f32 0.044715, %v1763_v17  ;;  %v1791_v21 = vmul.f32 0.7978846, %v1787_v6 }
 0xa90   :  { %v1773_v25 = vmul.f32 0.5, %v1763_v17 }
 0xa91   :  { %v1781_v16 = vmul.f32 %v1777_v10, %v1763_v17  ;;  %2792 = vtanh.f32 %v1791_v21  ;;  %v1786_v19 = vmul.f32 %v1782_v5, %v1768_v52 }
 0xa93   :  { %v1785_v44 = vmul.f32 %v1781_v16, %v1763_v17  ;;  %v1790_v22 = vadd.f32 %v1786_v19, %v1768_v52  ;;  %v1974_v52 = vld [vmem:[#allocation2 + $0x3d8] sm:$0xff] }
 0xa95   :  { %v1789_v49 = vadd.f32 %v1785_v44, %v1763_v17  ;;  %v1794_v30 = vmul.f32 0.7978846, %v1790_v22 }
 0xa97   :  { %v1793_v58 = vmul.f32 0.7978846, %v1789_v49  ;;  %2794 = vtanh.f32 %v1794_v30 }
 0xa99   :  { %2796 = vtanh.f32 %v1793_v58 }
 0xa9c   :  { %v2791_v23 = vpop.eup %2790 }
 0xa9d   :  { %v1800_v42 = vadd.f32 1.0, %v2791_v23 }
 0xa9e   :  { %v2793_v11 = vpop.eup %2792 }
 0xa9f   :  { %v1799_v53 = vadd.f32 1.0, %v2793_v11  ;;  %v1804_v61 = vmul.f32 %v1800_v42, %v1772_v18 }
 0xaa1   :  { %v1803_v24 = vmul.f32 %v1799_v53, %v1771_v27 }
 0xaa3   :  { %2638 = vmatprep.mubr.f32.mxu0 %v1803_v24 }
 0xaa4   :  { %v2795_v28 = vpop.eup %2794  ;;  %2639 = vmatmul.mubr.f32.vlgmr.msra.gmra.mxu0 %v1804_v61 }
 0xaa5   :  { %v1802_v15 = vadd.f32 1.0, %v2795_v28 }
 0xaa6   :  { %v2797_v35 = vpop.eup %2796 }
 0xaa7   :  { %v1801_v38 = vadd.f32 1.0, %v2797_v35  ;;  %v1806_v14 = vmul.f32 %v1802_v15, %v1774_v45 }
 0xaa9   :  { %v1805_v39 = vmul.f32 %v1801_v38, %v1773_v25 }
 0xaab   :  { %2641 = vmatprep.mubr.f32.mxu0 %v1805_v39 }
 0xaac   :  { %2642 = vmatmul.mubr.f32.gmra.mxu0 %v1806_v14 }
 0xb64   :  { %v2640_v3 = vpop.f32.mrf.mxu0 }
 0xb65   :  { %v1909_v43 = vadd.f32 %v2640_v3, %v3354_v36 }
 0xb66   :  { %v1889_v34 = vpop.f32.mrf.mxu0 }
 0xb67   :  { %v3382_v12 = vadd.f32 %v2146_v33, %v1909_v43  ;;  %v1908_v48 = vadd.f32 %v1889_v34, %v3357_v26 }
 0xb69   :  { %v3385_v54 = vadd.f32 %v2146_v33, %v1908_v48  ;;  %1923 = vadd.xlane.f32.xlu1 %v3382_v12  ;;  %v1930_v51 = vmul.f32 %v3382_v12, %v3382_v12 }
 0xb6b   :  { %1921 = vadd.xlane.f32.xlu0 %v3385_v54  ;;  %v1929_v36 = vmul.f32 %v3385_v54, %v3385_v54 }
 0xb6c   :  { %v2643_v55 = vpop.f32.mrf.mxu0 }
 0xb6d   :  { %v1911_v59 = vadd.f32 %v2643_v55, %v3367_v40  ;;  %1935 = vadd.xlane.f32.xlu1 %v1930_v51 }
 0xb6e   :  { %v1899_v62 = vpop.f32.mrf.mxu0 }
 0xb6f   :  { %v3394_v31 = vadd.f32 %v2146_v33, %v1911_v59  ;;  %v1910_v26 = vadd.f32 %v1899_v62, %v3369_v41  ;;  %1933 = vadd.xlane.f32.xlu0 %v1929_v36  ;;  %v1984_v41 = vld [vmem:[#allocation2 + $0x428] sm:$0xff]  ;;  %v2147_v59 = vld [vmem:[#allocation2 + $0x450] ss:$0 sm:$0xff] }
 0xb70   :  { %2652 = vmatprep.subr.mxu1 %v1984_v41 }
 0xb71   :  { %v3397_v56 = vadd.f32 %v2146_v33, %v1910_v26  ;;  %1927 = vadd.xlane.f32.xlu1 %v3394_v31  ;;  %v1932_v0 = vmul.f32 %v3394_v31, %v3394_v31  ;;  %2653 = vmatpush3.msra.mxu1 %v1984_v41 }
 0xb72   :  { %2654 = vmatprep.subr.mxu1 %v1983_v50 }
 0xb73   :  { %1925 = vadd.xlane.f32.xlu0 %v3397_v56  ;;  %v1931_v40 = vmul.f32 %v3397_v56, %v3397_v56  ;;  %2655 = vmatpush3.msra.mxu1 %v1983_v50 }
 0xb74   :  { %2656 = vmatprep.subr.mxu1 %v1982_v29 }
 0xb75   :  { %1939 = vadd.xlane.f32.xlu1 %v1932_v0  ;;  %2657 = vmatpush3.msra.mxu1 %v1982_v29 }
 0xb76   :  { %2658 = vmatprep.subr.mxu1 %v1981_v60 }
 0xb77   :  { %1937 = vadd.xlane.f32.xlu0 %v1931_v40  ;;  %2659 = vmatpush3.msra.mxu1 %v1981_v60 }
 0xb78   :  { %2660 = vmatprep.subr.mxu1 %v1980_v20 }
 0xb79   :  { %2661 = vmatpush3.msra.mxu1 %v1980_v20 }
 0xb7a   :  { %2662 = vmatprep.subr.mxu1 %v1979_v63 }
 0xb7b   :  { %2663 = vmatpush3.msra.mxu1 %v1979_v63 }
 0xb7c   :  { %2664 = vmatprep.subr.mxu1 %v1978_v1 }
 0xb7d   :  { %2665 = vmatpush3.msra.mxu1 %v1978_v1 }
 0xb7e   :  { %2666 = vmatprep.subr.mxu1 %v1977_v4 }
 0xb7f   :  { %2667 = vmatpush3.msra.mxu1 %v1977_v4 }
 0xb80   :  { %2668 = vmatprep.subr.mxu1 %v1976_v32 }
 0xb81   :  { %2669 = vmatpush3.msra.mxu1 %v1976_v32 }
 0xb82   :  { %2670 = vmatprep.subr.mxu1 %v1975_v2 }
 0xb83   :  { %2671 = vmatpush3.msra.mxu1 %v1975_v2 }
 0xb84   :  { %2672 = vmatprep.subr.mxu1 %v1974_v52 }
 0xb85   :  { %2673 = vmatpush3.msra.mxu1 %v1974_v52 }
 0xb86   :  { %2674 = vmatprep.subr.mxu1 %v1973_v13 }
 0xb87   :  { %2675 = vmatpush3.msra.mxu1 %v1973_v13 }
 0xbf2   :  { %v1924_v46 = vpop.xlane.xlu1 %1923 }
 0xbf3   :  { %v1942_v9 = vmul.f32 0.0078125, %v1924_v46 }
 0xbf4   :  { %v1922_v7 = vpop.xlane.xlu0 %1921 }
 0xbf5   :  { %v1941_v17 = vmul.f32 0.0078125, %v1922_v7  ;;  %v1950_v5 = vmul.f32 %v1942_v9, %v1942_v9  ;;  %v1966_v47 = vsub.f32 %v3382_v12, %v1942_v9 }
 0xbf6   :  { %v1936_v6 = vpop.xlane.xlu1 %1935 }
 0xbf7   :  { %v1946_v10 = vmul.f32 0.0078125, %v1936_v6  ;;  %v1949_v16 = vmul.f32 %v1941_v17, %v1941_v17  ;;  %v1965_v39 = vsub.f32 %v3385_v54, %v1941_v17 }
 0xbf8   :  { %v1934_v21 = vpop.xlane.xlu0 %1933 }
 0xbf9   :  { %v1954_v19 = vsub.f32 %v1946_v10, %v1950_v5  ;;  %v1945_v44 = vmul.f32 0.0078125, %v1934_v21 }
 0xbfa   :  { %v1928_v22 = vpop.xlane.xlu1 %1927 }
 0xbfb   :  { %v1958_v49 = vadd.f32 1e-05, %v1954_v19  ;;  %v1953_v30 = vsub.f32 %v1945_v44, %v1949_v16  ;;  %v1944_v58 = vmul.f32 0.0078125, %v1928_v22 }
 0xbfc   :  { %v1926_v23 = vpop.xlane.xlu0 %1925 }
 0xbfd   :  { %v1957_v11 = vadd.f32 1e-05, %v1953_v30  ;;  %2798 = vrsqrt.f32 %v1958_v49  ;;  %v1943_v42 = vmul.f32 0.0078125, %v1926_v23  ;;  %v1952_v53 = vmul.f32 %v1944_v58, %v1944_v58 }
 0xbfe   :  { %v1940_v27 = vpop.xlane.xlu1 %1939  ;;  %v1968_v48 = vsub.f32 %v3394_v31, %v1944_v58 }
 0xbff   :  { %2800 = vrsqrt.f32 %v1957_v11  ;;  %v1948_v18 = vmul.f32 0.0078125, %v1940_v27  ;;  %v1951_v61 = vmul.f32 %v1943_v42, %v1943_v42  ;;  %v1967_v43 = vsub.f32 %v3397_v56, %v1943_v42 }
 0xc00   :  { %v1938_v24 = vpop.xlane.xlu0 %1937 }
 0xc01   :  { %v1956_v28 = vsub.f32 %v1948_v18, %v1952_v53  ;;  %v1947_v35 = vmul.f32 0.0078125, %v1938_v24 }
 0xc03   :  { %v1960_v15 = vadd.f32 1e-05, %v1956_v28  ;;  %v1955_v25 = vsub.f32 %v1947_v35, %v1951_v61 }
 0xc05   :  { %v1959_v38 = vadd.f32 1e-05, %v1955_v25  ;;  %2802 = vrsqrt.f32 %v1960_v15 }
 0xc07   :  { %2804 = vrsqrt.f32 %v1959_v38 }
 0xc0a   :  { %v2799_v45 = vpop.eup %2798 }
 0xc0b   :  { %v1970_v3 = vmul.f32 %v2799_v45, %v1966_v47 }
 0xc0c   :  { %v2801_v14 = vpop.eup %2800 }
 0xc0d   :  { %v1969_v37 = vmul.f32 %v2801_v14, %v1965_v39 }
 0xc0f   :  { %2676 = vmatprep.mubr.f32.mxu1 %v1969_v37 }
 0xc10   :  { %2677 = vmatmul.mubr.f32.vlgmr.msra.gmra.mxu1 %v1970_v3 }
 0xc12   :  { %v2803_v33 = vpop.eup %2802 }
 0xc13   :  { %v1972_v55 = vmul.f32 %v2803_v33, %v1968_v48 }
 0xc14   :  { %v2805_v34 = vpop.eup %2804 }
 0xc15   :  { %v1971_v51 = vmul.f32 %v2805_v34, %v1967_v43 }
 0xc17   :  { %2679 = vmatprep.mubr.f32.mxu1 %v1971_v51 }
 0xc18   :  { %2680 = vmatmul.mubr.f32.gmra.mxu1 %v1972_v55 }
 0xcd0   :  { %v2678_v36 = vpop.f32.mrf.mxu1 }
 0xcd1   :  { %v2066_v54 = vadd.f32 %v2678_v36, %v2147_v59 }
 0xcd2   :  { %v2060_v62 = vpop.f32.mrf.mxu1 }
 0xcd3   :  { %2080 = vst [vmem:[#allocation5 + $0x8] sm:$0xff] %v2066_v54  ;;  %v2061_v12 = vadd.f32 %v2147_v59, %v2060_v62 }
 0xcd5   :  { %2079 = vst [vmem:[#allocation5] sm:$0xff] %v2061_v12 }
 0xcd8   :  { %v2681_v26 = vpop.f32.mrf.mxu1 }
 0xcd9   :  { %v2076_v0 = vadd.f32 %v2681_v26, %v2147_v59 }
 0xcda   :  { %v2070_v40 = vpop.f32.mrf.mxu1 }
 0xcdb   :  { %2082 = vst [vmem:[#allocation5 + $0x18] sm:$0xff] %v2076_v0  ;;  %v2071_v56 = vadd.f32 %v2147_v59, %v2070_v40 }
 0xcdd   :  { %2081 = vst [vmem:[#allocation5 + $0x10] sm:$0xff] %v2071_v56 }
 0xcde   :  { %2837 = shalt.err (!%p2834_p9)
}
 0xcdf   :  { %2094 = dma.vmem_to_hbm [thread:$0]  %s2089_s15, 512, %s3419_s4, [#allocation4], %s2851_s18, %s2851_s18, %s2852_s19  }
 0xce0   :  { %2848 = dma.done.wait [#allocation4], 512  }
 0xce1   :  { %2849 = vsyncadd [#allocation4], 4294966784 }
 0xce2   :  { %2098 = vsyncpa [#allocation3], 1 }
 0xce3   :  { %2099 = vsyncpa [#allocation4], 1 }

</bundles_post_ra>
